<compile_context>
chip_gen: v6e
topology: v6e:2x2x1
jax: 0.10.0
libtpu: 0.0.40
codegen_flags: <defaults>
</compile_context>

<pallas_src>
import math
import functools

import jax
import jax.numpy as jnp
from jax.experimental import pallas as pl
from jax.experimental.pallas import tpu as pltpu


# ----------------------------------------------------------------------------
# Fused kernel: `batch_tile` batch elements per grid step.
# ----------------------------------------------------------------------------
def _transcae_kernel(x_ref, wqkv_ref, bqkv_ref, wout_ref, bout_ref,
                     n1w_ref, n1b_ref, w1_ref, b1_ref, w2_ref, b2_ref,
                     n2w_ref, n2b_ref, wres_ref, bres_ref, out_ref,
                     *, n_heads):
    f32 = jnp.float32
    bf16 = jnp.bfloat16
    TB, S, D = x_ref.shape
    N = TB * S
    dk = D // n_heads
    scale = 1.0 / math.sqrt(dk)

    # Fold the batch tile into the sublane (row) axis for all dense ops.
    x = x_ref[...].reshape(N, D)                    # (N, D), f32
    xb = x.astype(bf16)

    # ---- fused QKV projection: (N, D) @ (D, 3D), bf16 in / f32 acc ----
    qkv = jnp.dot(xb, wqkv_ref[...], preferred_element_type=f32) + bqkv_ref[...]
    q = qkv[:, :D].reshape(TB, S, D)
    k = qkv[:, D:2 * D].reshape(TB, S, D)
    v = qkv[:, 2 * D:].reshape(TB, S, D)

    # ---- per-head attention, batched over the TB elements in this block ----
    dn_qkt = (((2,), (2,)), ((0,), (0,)))           # q @ k^T  (contract dk, batch TB)
    dn_pv = (((2,), (1,)), ((0,), (0,)))            # p @ v    (contract S,  batch TB)
    head_outs = []
    for h in range(n_heads):                        # static 4-iteration loop
        lo = h * dk
        qh = q[:, :, lo:lo + dk].astype(bf16)
        kh = k[:, :, lo:lo + dk].astype(bf16)
        vh = v[:, :, lo:lo + dk].astype(bf16)
        s = jax.lax.dot_general(qh, kh, dn_qkt, preferred_element_type=f32) * scale
        m = jnp.max(s, axis=-1, keepdims=True)
        e = jnp.exp(s - m)                          # f32, rides the EUP slot
        inv = pl.reciprocal(jnp.sum(e, axis=-1, keepdims=True), approx=True)
        p = (e * inv).astype(bf16)
        head_outs.append(jax.lax.dot_general(p, vh, dn_pv,
                                             preferred_element_type=f32))
    ctx = jnp.concatenate(head_outs, axis=-1).reshape(N, D)     # (N, D), f32

    attn_out = (jnp.dot(ctx.astype(bf16), wout_ref[...],
                        preferred_element_type=f32) + bout_ref[...])

    # ---- LayerNorm over features (biased variance, eps=1e-5), f32 math ----
    def layer_norm(y, w_ref, b_ref):
        mean = jnp.mean(y, axis=-1, keepdims=True)
        var = jnp.mean((y - mean) ** 2, axis=-1, keepdims=True)
        return (y - mean) * jax.lax.rsqrt(var + 1e-5) * w_ref[...] + b_ref[...]

    x1 = layer_norm(x + attn_out, n1w_ref, n1b_ref)

    # ---- MLP: Linear -> ReLU -> Linear ----
    h1 = jnp.dot(x1.astype(bf16), w1_ref[...], preferred_element_type=f32) + b1_ref[...]
    h1 = jnp.maximum(h1, 0.0)
    mlp = jnp.dot(h1.astype(bf16), w2_ref[...], preferred_element_type=f32) + b2_ref[...]

    x2 = layer_norm(x1 + mlp, n2w_ref, n2b_ref)

    # ---- residual linear + final ReLU ----
    res = jnp.dot(x2.astype(bf16), wres_ref[...], preferred_element_type=f32) + bres_ref[...]
    out_ref[...] = jnp.maximum(x2 + res, 0.0).reshape(TB, S, D)


def transcae_forward(x, params, *, n_heads=4, batch_tile=None):
    B, S, D = x.shape
    E = params['w_mlp1'].shape[1]

    if batch_tile is None:
        # Small B: one fat step (no per-step overhead; ideal for 1-TC v5e/v6e).
        # Large even B: two fat steps so both v7x TensorCores get one launch.
        batch_tile = B if (B < 16 or B % 2 != 0) else B // 2
    assert B % batch_tile == 0, "batch_tile must divide the batch size"
    n_steps = B // batch_tile

    bf16 = jnp.bfloat16
    w_qkv = params['w_qkv'].astype(bf16)
    w_out = params['w_out'].astype(bf16)
    w_mlp1 = params['w_mlp1'].astype(bf16)
    w_mlp2 = params['w_mlp2'].astype(bf16)
    w_res = params['w_res'].astype(bf16)

    kernel = functools.partial(_transcae_kernel, n_heads=n_heads)

    def resident(shape):                            # weight slab, constant across grid
        nd = len(shape)
        return pl.BlockSpec(shape, lambda b, _nd=nd: (0,) * _nd)

    in_specs = [
        pl.BlockSpec((batch_tile, S, D), lambda b: (b, 0, 0)),   # x
        resident((D, 3 * D)), resident((1, 3 * D)),              # fused QKV weight/bias
        resident((D, D)), resident((1, D)),                      # out_proj
        resident((1, D)), resident((1, D)),                      # norm1 weight/bias
        resident((D, E)), resident((1, E)),                      # mlp linear 1
        resident((E, D)), resident((1, D)),                      # mlp linear 2
        resident((1, D)), resident((1, D)),                      # norm2 weight/bias
        resident((D, D)), resident((1, D)),                      # res_linear
    ]

    return pl.pallas_call(
        kernel,
        out_shape=jax.ShapeDtypeStruct((B, S, D), jnp.float32),
        grid=(n_steps,),
        in_specs=in_specs,
        out_specs=pl.BlockSpec((batch_tile, S, D), lambda b: (b, 0, 0)),
        compiler_params=pltpu.CompilerParams(
            dimension_semantics=("parallel",),
            vmem_limit_bytes=64 * 1024 * 1024),
    )(x,
      w_qkv, params['b_qkv'],
      w_out, params['b_out'],
      params['norm1_w'], params['norm1_b'],
      w_mlp1, params['b_mlp1'],
      w_mlp2, params['b_mlp2'],
      params['norm2_w'], params['norm2_b'],
      w_res, params['b_res'])


# ----------------------------------------------------------------------------
# Deterministic parameter init (weights pre-transposed to (in, out) layout;
# biases stored as (1, n) for lane-friendly kernel broadcasting).
# ----------------------------------------------------------------------------
def init_params(key, embed_dim, n_heads=4, expansion_ratio=4):
    D = embed_dim
    E = D * expansion_ratio

    def uniform(k, shape, fan_in):
        bound = 1.0 / math.sqrt(fan_in)
        return jax.random.uniform(k, shape, jnp.float32, -bound, bound)

    ks = jax.random.split(key, 14)
    return {
        'w_qkv':   uniform(ks[0], (D, 3 * D), D),
        'b_qkv':   uniform(ks[1], (1, 3 * D), D),
        'w_out':   uniform(ks[2], (D, D), D),
        'b_out':   uniform(ks[3], (1, D), D),
        'norm1_w': 1.0 + 0.1 * jax.random.normal(ks[4], (1, D), jnp.float32),
        'norm1_b': 0.1 * jax.random.normal(ks[5], (1, D), jnp.float32),
        'w_mlp1':  uniform(ks[6], (D, E), D),
        'b_mlp1':  uniform(ks[7], (1, E), D),
        'w_mlp2':  uniform(ks[8], (E, D), E),
        'b_mlp2':  uniform(ks[9], (1, D), E),
        'norm2_w': 1.0 + 0.1 * jax.random.normal(ks[10], (1, D), jnp.float32),
        'norm2_b': 0.1 * jax.random.normal(ks[11], (1, D), jnp.float32),
        'w_res':   uniform(ks[12], (D, D), D),
        'b_res':   uniform(ks[13], (1, D), D),
    }


# ----------------------------------------------------------------------------
# Pure-JAX f32 reference mirroring the PyTorch forward.
# ----------------------------------------------------------------------------
def reference_forward(x, params, n_heads=4):
    B, S, D = x.shape
    dk = D // n_heads

    qkv = x @ params['w_qkv'] + params['b_qkv'][0]
    q, k, v = qkv[..., :D], qkv[..., D:2 * D], qkv[..., 2 * D:]
    q = q.reshape(B, S, n_heads, dk)
    k = k.reshape(B, S, n_heads, dk)
    v = v.reshape(B, S, n_heads, dk)
    scores = jnp.einsum('bihd,bjhd->bhij', q, k) / math.sqrt(dk)
    attn = jax.nn.softmax(scores, axis=-1)
    ctx = jnp.einsum('bhij,bjhd->bihd', attn, v).reshape(B, S, D)
    attn_out = ctx @ params['w_out'] + params['b_out'][0]

    def ln(y, w, b):
        mean = jnp.mean(y, axis=-1, keepdims=True)
        var = jnp.var(y, axis=-1, keepdims=True)        # biased, like nn.LayerNorm
        return (y - mean) / jnp.sqrt(var + 1e-5) * w[0] + b[0]

    x1 = ln(x + attn_out, params['norm1_w'], params['norm1_b'])
    h = jax.nn.relu(x1 @ params['w_mlp1'] + params['b_mlp1'][0])
    mlp = h @ params['w_mlp2'] + params['b_mlp2'][0]
    x2 = ln(x1 + mlp, params['norm2_w'], params['norm2_b'])
    return jax.nn.relu(x2 + x2 @ params['w_res'] + params['b_res'][0])


if __name__ == "__main__":
    embed_dim, n_heads, expansion_ratio = 32, 4, 4
    B, S = 2, 8

    key = jax.random.PRNGKey(0)
    kp, kx = jax.random.split(key)
    params = init_params(kp, embed_dim, n_heads, expansion_ratio)
    x = jax.random.normal(kx, (B, S, embed_dim), jnp.float32)

    out = transcae_forward(x, params, n_heads=n_heads)
    jax.block_until_ready(out)

    ref = reference_forward(x, params, n_heads=n_heads)
    assert out.shape == (B, S, embed_dim)
    err = float(jnp.max(jnp.abs(out - ref)))
    # Tolerance relaxed vs. the f32 version: bf16 matmul operands (f32 acc)
    # plus the approximate softmax reciprocal stack two small approximations.
    assert jnp.allclose(out, ref, atol=2e-2, rtol=2e-2), f"max abs err {err}"

    print("KERNEL_OK")
</pallas_src>

<mosaic_0001>
module attributes {stable_mosaic.version = 11 : i64} {
  func.func @_transcae_kernel(%arg0: i32, %arg1: memref<2x8x32xf32, #tpu.memory_space<vmem>>, %arg2: memref<32x96xbf16, #tpu.memory_space<vmem>>, %arg3: memref<1x96xf32, #tpu.memory_space<vmem>>, %arg4: memref<32x32xbf16, #tpu.memory_space<vmem>>, %arg5: memref<1x32xf32, #tpu.memory_space<vmem>>, %arg6: memref<1x32xf32, #tpu.memory_space<vmem>>, %arg7: memref<1x32xf32, #tpu.memory_space<vmem>>, %arg8: memref<32x128xbf16, #tpu.memory_space<vmem>>, %arg9: memref<1x128xf32, #tpu.memory_space<vmem>>, %arg10: memref<128x32xbf16, #tpu.memory_space<vmem>>, %arg11: memref<1x32xf32, #tpu.memory_space<vmem>>, %arg12: memref<1x32xf32, #tpu.memory_space<vmem>>, %arg13: memref<1x32xf32, #tpu.memory_space<vmem>>, %arg14: memref<32x32xbf16, #tpu.memory_space<vmem>>, %arg15: memref<1x32xf32, #tpu.memory_space<vmem>>, %arg16: memref<2x8x32xf32, #tpu.memory_space<vmem>>) attributes {dimension_semantics = [#tpu.dimension_semantics<parallel>], iteration_bounds = array<i64: 1>, scalar_prefetch = 0 : i64, scratch_operands = 0 : i64, tpu.core_type = #tpu.core_type<tc>, window_params = [{transform_indices = @transform_0, window_bounds = array<i64: 2, 8, 32>}, {pipeline_mode = #tpu.pipeline_mode<synchronous>, transform_indices = @transform_1, window_bounds = array<i64: 32, 96>}, {pipeline_mode = #tpu.pipeline_mode<synchronous>, transform_indices = @transform_2, window_bounds = array<i64: 1, 96>}, {pipeline_mode = #tpu.pipeline_mode<synchronous>, transform_indices = @transform_3, window_bounds = array<i64: 32, 32>}, {pipeline_mode = #tpu.pipeline_mode<synchronous>, transform_indices = @transform_4, window_bounds = array<i64: 1, 32>}, {pipeline_mode = #tpu.pipeline_mode<synchronous>, transform_indices = @transform_5, window_bounds = array<i64: 1, 32>}, {pipeline_mode = #tpu.pipeline_mode<synchronous>, transform_indices = @transform_6, window_bounds = array<i64: 1, 32>}, {pipeline_mode = #tpu.pipeline_mode<synchronous>, transform_indices = @transform_7, window_bounds = array<i64: 32, 128>}, {pipeline_mode = #tpu.pipeline_mode<synchronous>, transform_indices = @transform_8, window_bounds = array<i64: 1, 128>}, {pipeline_mode = #tpu.pipeline_mode<synchronous>, transform_indices = @transform_9, window_bounds = array<i64: 128, 32>}, {pipeline_mode = #tpu.pipeline_mode<synchronous>, transform_indices = @transform_10, window_bounds = array<i64: 1, 32>}, {pipeline_mode = #tpu.pipeline_mode<synchronous>, transform_indices = @transform_11, window_bounds = array<i64: 1, 32>}, {pipeline_mode = #tpu.pipeline_mode<synchronous>, transform_indices = @transform_12, window_bounds = array<i64: 1, 32>}, {pipeline_mode = #tpu.pipeline_mode<synchronous>, transform_indices = @transform_13, window_bounds = array<i64: 32, 32>}, {pipeline_mode = #tpu.pipeline_mode<synchronous>, transform_indices = @transform_14, window_bounds = array<i64: 1, 32>}, {transform_indices = @transform_15, window_bounds = array<i64: 2, 8, 32>}]} {
    %c0 = arith.constant 0 : index
    %c0_0 = arith.constant 0 : index
    %c0_1 = arith.constant 0 : index
    %0 = vector.load %arg1[%c0, %c0_0, %c0_1] : memref<2x8x32xf32, #tpu.memory_space<vmem>>, vector<2x8x32xf32>
    %1 = vector.shape_cast %0 : vector<2x8x32xf32> to vector<16x32xf32>
    %2 = arith.truncf %1 : vector<16x32xf32> to vector<16x32xbf16>
    %c0_2 = arith.constant 0 : index
    %c0_3 = arith.constant 0 : index
    %3 = vector.load %arg2[%c0_2, %c0_3] : memref<32x96xbf16, #tpu.memory_space<vmem>>, vector<32x96xbf16>
    %cst = arith.constant dense<0.000000e+00> : vector<16x96xf32>
    %4 = tpu.matmul %2, %3, %cst {dimension_numbers = #tpu.dot_dimension_numbers<[1], [0], [0], [1], [0, 0, 1, 1], [], []>} : vector<16x32xbf16>, vector<32x96xbf16>, vector<16x96xf32> -> vector<16x96xf32>
    %c0_4 = arith.constant 0 : index
    %c0_5 = arith.constant 0 : index
    %5 = vector.load %arg3[%c0_4, %c0_5] : memref<1x96xf32, #tpu.memory_space<vmem>>, vector<1x96xf32>
    %6 = vector.broadcast %5 : vector<1x96xf32> to vector<16x96xf32>
    %7 = arith.addf %4, %6 : vector<16x96xf32>
    %8 = vector.extract_strided_slice %7 {offsets = [0, 0], sizes = [16, 32], strides = [1, 1]} : vector<16x96xf32> to vector<16x32xf32>
    %9 = vector.shape_cast %8 : vector<16x32xf32> to vector<2x8x32xf32>
    %10 = vector.extract_strided_slice %7 {offsets = [0, 32], sizes = [16, 32], strides = [1, 1]} : vector<16x96xf32> to vector<16x32xf32>
    %11 = vector.shape_cast %10 : vector<16x32xf32> to vector<2x8x32xf32>
    %12 = vector.extract_strided_slice %7 {offsets = [0, 64], sizes = [16, 32], strides = [1, 1]} : vector<16x96xf32> to vector<16x32xf32>
    %13 = vector.shape_cast %12 : vector<16x32xf32> to vector<2x8x32xf32>
    %14 = vector.extract_strided_slice %9 {offsets = [0, 0, 0], sizes = [2, 8, 8], strides = [1, 1, 1]} : vector<2x8x32xf32> to vector<2x8x8xf32>
    %15 = arith.truncf %14 : vector<2x8x8xf32> to vector<2x8x8xbf16>
    %16 = vector.extract_strided_slice %11 {offsets = [0, 0, 0], sizes = [2, 8, 8], strides = [1, 1, 1]} : vector<2x8x32xf32> to vector<2x8x8xf32>
    %17 = arith.truncf %16 : vector<2x8x8xf32> to vector<2x8x8xbf16>
    %18 = vector.extract_strided_slice %13 {offsets = [0, 0, 0], sizes = [2, 8, 8], strides = [1, 1, 1]} : vector<2x8x32xf32> to vector<2x8x8xf32>
    %19 = arith.truncf %18 : vector<2x8x8xf32> to vector<2x8x8xbf16>
    %cst_6 = arith.constant dense<0.000000e+00> : vector<2x8x8xf32>
    %20 = tpu.matmul %15, %17, %cst_6 {dimension_numbers = #tpu.dot_dimension_numbers<[2], [2], [1], [1], [0, 0, 0, 1, 1, 1], [0], [0]>} : vector<2x8x8xbf16>, vector<2x8x8xbf16>, vector<2x8x8xf32> -> vector<2x8x8xf32>
    %cst_7 = arith.constant 0.353553385 : f32
    %21 = vector.broadcast %cst_7 : f32 to vector<2x8x8xf32>
    %22 = arith.mulf %20, %21 : vector<2x8x8xf32>
    %cst_8 = arith.constant dense<0xFF800000> : vector<2x8xf32>
    %23 = vector.multi_reduction <maximumf>, %22, %cst_8 [2] : vector<2x8x8xf32> to vector<2x8xf32>
    %24 = vector.shape_cast %23 : vector<2x8xf32> to vector<2x8x1xf32>
    %25 = vector.broadcast %24 : vector<2x8x1xf32> to vector<2x8x8xf32>
    %26 = arith.subf %22, %25 : vector<2x8x8xf32>
    %27 = math.exp %26 : vector<2x8x8xf32>
    %cst_9 = arith.constant dense<0.000000e+00> : vector<2x8xf32>
    %28 = vector.multi_reduction <add>, %27, %cst_9 [2] : vector<2x8x8xf32> to vector<2x8xf32>
    %29 = vector.shape_cast %28 : vector<2x8xf32> to vector<2x8x1xf32>
    %30 = tpu.reciprocal %29 {approx = true} : vector<2x8x1xf32> -> vector<2x8x1xf32>
    %31 = vector.broadcast %30 : vector<2x8x1xf32> to vector<2x8x8xf32>
    %32 = arith.mulf %27, %31 : vector<2x8x8xf32>
    %33 = arith.truncf %32 : vector<2x8x8xf32> to vector<2x8x8xbf16>
    %cst_10 = arith.constant dense<0.000000e+00> : vector<2x8x8xf32>
    %34 = tpu.matmul %33, %19, %cst_10 {dimension_numbers = #tpu.dot_dimension_numbers<[2], [1], [1], [2], [0, 0, 0, 1, 1, 2], [0], [0]>} : vector<2x8x8xbf16>, vector<2x8x8xbf16>, vector<2x8x8xf32> -> vector<2x8x8xf32>
    %35 = vector.extract_strided_slice %9 {offsets = [0, 0, 8], sizes = [2, 8, 8], strides = [1, 1, 1]} : vector<2x8x32xf32> to vector<2x8x8xf32>
    %36 = arith.truncf %35 : vector<2x8x8xf32> to vector<2x8x8xbf16>
    %37 = vector.extract_strided_slice %11 {offsets = [0, 0, 8], sizes = [2, 8, 8], strides = [1, 1, 1]} : vector<2x8x32xf32> to vector<2x8x8xf32>
    %38 = arith.truncf %37 : vector<2x8x8xf32> to vector<2x8x8xbf16>
    %39 = vector.extract_strided_slice %13 {offsets = [0, 0, 8], sizes = [2, 8, 8], strides = [1, 1, 1]} : vector<2x8x32xf32> to vector<2x8x8xf32>
    %40 = arith.truncf %39 : vector<2x8x8xf32> to vector<2x8x8xbf16>
    %cst_11 = arith.constant dense<0.000000e+00> : vector<2x8x8xf32>
    %41 = tpu.matmul %36, %38, %cst_11 {dimension_numbers = #tpu.dot_dimension_numbers<[2], [2], [1], [1], [0, 0, 0, 1, 1, 1], [0], [0]>} : vector<2x8x8xbf16>, vector<2x8x8xbf16>, vector<2x8x8xf32> -> vector<2x8x8xf32>
    %cst_12 = arith.constant 0.353553385 : f32
    %42 = vector.broadcast %cst_12 : f32 to vector<2x8x8xf32>
    %43 = arith.mulf %41, %42 : vector<2x8x8xf32>
    %cst_13 = arith.constant dense<0xFF800000> : vector<2x8xf32>
    %44 = vector.multi_reduction <maximumf>, %43, %cst_13 [2] : vector<2x8x8xf32> to vector<2x8xf32>
    %45 = vector.shape_cast %44 : vector<2x8xf32> to vector<2x8x1xf32>
    %46 = vector.broadcast %45 : vector<2x8x1xf32> to vector<2x8x8xf32>
    %47 = arith.subf %43, %46 : vector<2x8x8xf32>
    %48 = math.exp %47 : vector<2x8x8xf32>
    %cst_14 = arith.constant dense<0.000000e+00> : vector<2x8xf32>
    %49 = vector.multi_reduction <add>, %48, %cst_14 [2] : vector<2x8x8xf32> to vector<2x8xf32>
    %50 = vector.shape_cast %49 : vector<2x8xf32> to vector<2x8x1xf32>
    %51 = tpu.reciprocal %50 {approx = true} : vector<2x8x1xf32> -> vector<2x8x1xf32>
    %52 = vector.broadcast %51 : vector<2x8x1xf32> to vector<2x8x8xf32>
    %53 = arith.mulf %48, %52 : vector<2x8x8xf32>
    %54 = arith.truncf %53 : vector<2x8x8xf32> to vector<2x8x8xbf16>
    %cst_15 = arith.constant dense<0.000000e+00> : vector<2x8x8xf32>
    %55 = tpu.matmul %54, %40, %cst_15 {dimension_numbers = #tpu.dot_dimension_numbers<[2], [1], [1], [2], [0, 0, 0, 1, 1, 2], [0], [0]>} : vector<2x8x8xbf16>, vector<2x8x8xbf16>, vector<2x8x8xf32> -> vector<2x8x8xf32>
    %56 = vector.extract_strided_slice %9 {offsets = [0, 0, 16], sizes = [2, 8, 8], strides = [1, 1, 1]} : vector<2x8x32xf32> to vector<2x8x8xf32>
    %57 = arith.truncf %56 : vector<2x8x8xf32> to vector<2x8x8xbf16>
    %58 = vector.extract_strided_slice %11 {offsets = [0, 0, 16], sizes = [2, 8, 8], strides = [1, 1, 1]} : vector<2x8x32xf32> to vector<2x8x8xf32>
    %59 = arith.truncf %58 : vector<2x8x8xf32> to vector<2x8x8xbf16>
    %60 = vector.extract_strided_slice %13 {offsets = [0, 0, 16], sizes = [2, 8, 8], strides = [1, 1, 1]} : vector<2x8x32xf32> to vector<2x8x8xf32>
    %61 = arith.truncf %60 : vector<2x8x8xf32> to vector<2x8x8xbf16>
    %cst_16 = arith.constant dense<0.000000e+00> : vector<2x8x8xf32>
    %62 = tpu.matmul %57, %59, %cst_16 {dimension_numbers = #tpu.dot_dimension_numbers<[2], [2], [1], [1], [0, 0, 0, 1, 1, 1], [0], [0]>} : vector<2x8x8xbf16>, vector<2x8x8xbf16>, vector<2x8x8xf32> -> vector<2x8x8xf32>
    %cst_17 = arith.constant 0.353553385 : f32
    %63 = vector.broadcast %cst_17 : f32 to vector<2x8x8xf32>
    %64 = arith.mulf %62, %63 : vector<2x8x8xf32>
    %cst_18 = arith.constant dense<0xFF800000> : vector<2x8xf32>
    %65 = vector.multi_reduction <maximumf>, %64, %cst_18 [2] : vector<2x8x8xf32> to vector<2x8xf32>
    %66 = vector.shape_cast %65 : vector<2x8xf32> to vector<2x8x1xf32>
    %67 = vector.broadcast %66 : vector<2x8x1xf32> to vector<2x8x8xf32>
    %68 = arith.subf %64, %67 : vector<2x8x8xf32>
    %69 = math.exp %68 : vector<2x8x8xf32>
    %cst_19 = arith.constant dense<0.000000e+00> : vector<2x8xf32>
    %70 = vector.multi_reduction <add>, %69, %cst_19 [2] : vector<2x8x8xf32> to vector<2x8xf32>
    %71 = vector.shape_cast %70 : vector<2x8xf32> to vector<2x8x1xf32>
    %72 = tpu.reciprocal %71 {approx = true} : vector<2x8x1xf32> -> vector<2x8x1xf32>
    %73 = vector.broadcast %72 : vector<2x8x1xf32> to vector<2x8x8xf32>
    %74 = arith.mulf %69, %73 : vector<2x8x8xf32>
    %75 = arith.truncf %74 : vector<2x8x8xf32> to vector<2x8x8xbf16>
    %cst_20 = arith.constant dense<0.000000e+00> : vector<2x8x8xf32>
    %76 = tpu.matmul %75, %61, %cst_20 {dimension_numbers = #tpu.dot_dimension_numbers<[2], [1], [1], [2], [0, 0, 0, 1, 1, 2], [0], [0]>} : vector<2x8x8xbf16>, vector<2x8x8xbf16>, vector<2x8x8xf32> -> vector<2x8x8xf32>
    %77 = vector.extract_strided_slice %9 {offsets = [0, 0, 24], sizes = [2, 8, 8], strides = [1, 1, 1]} : vector<2x8x32xf32> to vector<2x8x8xf32>
    %78 = arith.truncf %77 : vector<2x8x8xf32> to vector<2x8x8xbf16>
    %79 = vector.extract_strided_slice %11 {offsets = [0, 0, 24], sizes = [2, 8, 8], strides = [1, 1, 1]} : vector<2x8x32xf32> to vector<2x8x8xf32>
    %80 = arith.truncf %79 : vector<2x8x8xf32> to vector<2x8x8xbf16>
    %81 = vector.extract_strided_slice %13 {offsets = [0, 0, 24], sizes = [2, 8, 8], strides = [1, 1, 1]} : vector<2x8x32xf32> to vector<2x8x8xf32>
    %82 = arith.truncf %81 : vector<2x8x8xf32> to vector<2x8x8xbf16>
    %cst_21 = arith.constant dense<0.000000e+00> : vector<2x8x8xf32>
    %83 = tpu.matmul %78, %80, %cst_21 {dimension_numbers = #tpu.dot_dimension_numbers<[2], [2], [1], [1], [0, 0, 0, 1, 1, 1], [0], [0]>} : vector<2x8x8xbf16>, vector<2x8x8xbf16>, vector<2x8x8xf32> -> vector<2x8x8xf32>
    %cst_22 = arith.constant 0.353553385 : f32
    %84 = vector.broadcast %cst_22 : f32 to vector<2x8x8xf32>
    %85 = arith.mulf %83, %84 : vector<2x8x8xf32>
    %cst_23 = arith.constant dense<0xFF800000> : vector<2x8xf32>
    %86 = vector.multi_reduction <maximumf>, %85, %cst_23 [2] : vector<2x8x8xf32> to vector<2x8xf32>
    %87 = vector.shape_cast %86 : vector<2x8xf32> to vector<2x8x1xf32>
    %88 = vector.broadcast %87 : vector<2x8x1xf32> to vector<2x8x8xf32>
    %89 = arith.subf %85, %88 : vector<2x8x8xf32>
    %90 = math.exp %89 : vector<2x8x8xf32>
    %cst_24 = arith.constant dense<0.000000e+00> : vector<2x8xf32>
    %91 = vector.multi_reduction <add>, %90, %cst_24 [2] : vector<2x8x8xf32> to vector<2x8xf32>
    %92 = vector.shape_cast %91 : vector<2x8xf32> to vector<2x8x1xf32>
    %93 = tpu.reciprocal %92 {approx = true} : vector<2x8x1xf32> -> vector<2x8x1xf32>
    %94 = vector.broadcast %93 : vector<2x8x1xf32> to vector<2x8x8xf32>
    %95 = arith.mulf %90, %94 : vector<2x8x8xf32>
    %96 = arith.truncf %95 : vector<2x8x8xf32> to vector<2x8x8xbf16>
    %cst_25 = arith.constant dense<0.000000e+00> : vector<2x8x8xf32>
    %97 = tpu.matmul %96, %82, %cst_25 {dimension_numbers = #tpu.dot_dimension_numbers<[2], [1], [1], [2], [0, 0, 0, 1, 1, 2], [0], [0]>} : vector<2x8x8xbf16>, vector<2x8x8xbf16>, vector<2x8x8xf32> -> vector<2x8x8xf32>
    %98 = tpu.concatenate %34, %55, %76, %97 in 2 : vector<2x8x8xf32>, vector<2x8x8xf32>, vector<2x8x8xf32>, vector<2x8x8xf32> -> vector<2x8x32xf32>
    %99 = vector.shape_cast %98 : vector<2x8x32xf32> to vector<16x32xf32>
    %100 = arith.truncf %99 : vector<16x32xf32> to vector<16x32xbf16>
    %c0_26 = arith.constant 0 : index
    %c0_27 = arith.constant 0 : index
    %101 = vector.load %arg4[%c0_26, %c0_27] : memref<32x32xbf16, #tpu.memory_space<vmem>>, vector<32x32xbf16>
    %cst_28 = arith.constant dense<0.000000e+00> : vector<16x32xf32>
    %102 = tpu.matmul %100, %101, %cst_28 {dimension_numbers = #tpu.dot_dimension_numbers<[1], [0], [0], [1], [0, 0, 1, 1], [], []>} : vector<16x32xbf16>, vector<32x32xbf16>, vector<16x32xf32> -> vector<16x32xf32>
    %c0_29 = arith.constant 0 : index
    %c0_30 = arith.constant 0 : index
    %103 = vector.load %arg5[%c0_29, %c0_30] : memref<1x32xf32, #tpu.memory_space<vmem>>, vector<1x32xf32>
    %104 = vector.broadcast %103 : vector<1x32xf32> to vector<16x32xf32>
    %105 = arith.addf %102, %104 : vector<16x32xf32>
    %106 = arith.addf %1, %105 : vector<16x32xf32>
    %cst_31 = arith.constant dense<0.000000e+00> : vector<16xf32>
    %107 = vector.multi_reduction <add>, %106, %cst_31 [1] : vector<16x32xf32> to vector<16xf32>
    %108 = vector.shape_cast %107 : vector<16xf32> to vector<16x1xf32>
    %cst_32 = arith.constant 3.200000e+01 : f32
    %109 = vector.broadcast %cst_32 : f32 to vector<16x1xf32>
    %110 = arith.divf %108, %109 : vector<16x1xf32>
    %111 = vector.broadcast %110 : vector<16x1xf32> to vector<16x32xf32>
    %112 = arith.subf %106, %111 : vector<16x32xf32>
    %113 = arith.mulf %112, %112 : vector<16x32xf32>
    %cst_33 = arith.constant dense<0.000000e+00> : vector<16xf32>
    %114 = vector.multi_reduction <add>, %113, %cst_33 [1] : vector<16x32xf32> to vector<16xf32>
    %115 = vector.shape_cast %114 : vector<16xf32> to vector<16x1xf32>
    %cst_34 = arith.constant 3.200000e+01 : f32
    %116 = vector.broadcast %cst_34 : f32 to vector<16x1xf32>
    %117 = arith.divf %115, %116 : vector<16x1xf32>
    %118 = vector.broadcast %110 : vector<16x1xf32> to vector<16x32xf32>
    %119 = arith.subf %106, %118 : vector<16x32xf32>
    %cst_35 = arith.constant 9.99999974E-6 : f32
    %120 = vector.broadcast %cst_35 : f32 to vector<16x1xf32>
    %121 = arith.addf %117, %120 : vector<16x1xf32>
    %122 = math.rsqrt %121 : vector<16x1xf32>
    %123 = vector.broadcast %122 : vector<16x1xf32> to vector<16x32xf32>
    %124 = arith.mulf %119, %123 : vector<16x32xf32>
    %c0_36 = arith.constant 0 : index
    %c0_37 = arith.constant 0 : index
    %125 = vector.load %arg6[%c0_36, %c0_37] : memref<1x32xf32, #tpu.memory_space<vmem>>, vector<1x32xf32>
    %126 = vector.broadcast %125 : vector<1x32xf32> to vector<16x32xf32>
    %127 = arith.mulf %124, %126 : vector<16x32xf32>
    %c0_38 = arith.constant 0 : index
    %c0_39 = arith.constant 0 : index
    %128 = vector.load %arg7[%c0_38, %c0_39] : memref<1x32xf32, #tpu.memory_space<vmem>>, vector<1x32xf32>
    %129 = vector.broadcast %128 : vector<1x32xf32> to vector<16x32xf32>
    %130 = arith.addf %127, %129 : vector<16x32xf32>
    %131 = arith.truncf %130 : vector<16x32xf32> to vector<16x32xbf16>
    %c0_40 = arith.constant 0 : index
    %c0_41 = arith.constant 0 : index
    %132 = vector.load %arg8[%c0_40, %c0_41] : memref<32x128xbf16, #tpu.memory_space<vmem>>, vector<32x128xbf16>
    %cst_42 = arith.constant dense<0.000000e+00> : vector<16x128xf32>
    %133 = tpu.matmul %131, %132, %cst_42 {dimension_numbers = #tpu.dot_dimension_numbers<[1], [0], [0], [1], [0, 0, 1, 1], [], []>} : vector<16x32xbf16>, vector<32x128xbf16>, vector<16x128xf32> -> vector<16x128xf32>
    %c0_43 = arith.constant 0 : index
    %c0_44 = arith.constant 0 : index
    %134 = vector.load %arg9[%c0_43, %c0_44] : memref<1x128xf32, #tpu.memory_space<vmem>>, vector<1x128xf32>
    %135 = vector.broadcast %134 : vector<1x128xf32> to vector<16x128xf32>
    %136 = arith.addf %133, %135 : vector<16x128xf32>
    %cst_45 = arith.constant 0.000000e+00 : f32
    %137 = vector.broadcast %cst_45 : f32 to vector<16x128xf32>
    %138 = arith.maximumf %136, %137 : vector<16x128xf32>
    %139 = arith.truncf %138 : vector<16x128xf32> to vector<16x128xbf16>
    %c0_46 = arith.constant 0 : index
    %c0_47 = arith.constant 0 : index
    %140 = vector.load %arg10[%c0_46, %c0_47] : memref<128x32xbf16, #tpu.memory_space<vmem>>, vector<128x32xbf16>
    %cst_48 = arith.constant dense<0.000000e+00> : vector<16x32xf32>
    %141 = tpu.matmul %139, %140, %cst_48 {dimension_numbers = #tpu.dot_dimension_numbers<[1], [0], [0], [1], [0, 0, 1, 1], [], []>} : vector<16x128xbf16>, vector<128x32xbf16>, vector<16x32xf32> -> vector<16x32xf32>
    %c0_49 = arith.constant 0 : index
    %c0_50 = arith.constant 0 : index
    %142 = vector.load %arg11[%c0_49, %c0_50] : memref<1x32xf32, #tpu.memory_space<vmem>>, vector<1x32xf32>
    %143 = vector.broadcast %142 : vector<1x32xf32> to vector<16x32xf32>
    %144 = arith.addf %141, %143 : vector<16x32xf32>
    %145 = arith.addf %130, %144 : vector<16x32xf32>
    %cst_51 = arith.constant dense<0.000000e+00> : vector<16xf32>
    %146 = vector.multi_reduction <add>, %145, %cst_51 [1] : vector<16x32xf32> to vector<16xf32>
    %147 = vector.shape_cast %146 : vector<16xf32> to vector<16x1xf32>
    %cst_52 = arith.constant 3.200000e+01 : f32
    %148 = vector.broadcast %cst_52 : f32 to vector<16x1xf32>
    %149 = arith.divf %147, %148 : vector<16x1xf32>
    %150 = vector.broadcast %149 : vector<16x1xf32> to vector<16x32xf32>
    %151 = arith.subf %145, %150 : vector<16x32xf32>
    %152 = arith.mulf %151, %151 : vector<16x32xf32>
    %cst_53 = arith.constant dense<0.000000e+00> : vector<16xf32>
    %153 = vector.multi_reduction <add>, %152, %cst_53 [1] : vector<16x32xf32> to vector<16xf32>
    %154 = vector.shape_cast %153 : vector<16xf32> to vector<16x1xf32>
    %cst_54 = arith.constant 3.200000e+01 : f32
    %155 = vector.broadcast %cst_54 : f32 to vector<16x1xf32>
    %156 = arith.divf %154, %155 : vector<16x1xf32>
    %157 = vector.broadcast %149 : vector<16x1xf32> to vector<16x32xf32>
    %158 = arith.subf %145, %157 : vector<16x32xf32>
    %cst_55 = arith.constant 9.99999974E-6 : f32
    %159 = vector.broadcast %cst_55 : f32 to vector<16x1xf32>
    %160 = arith.addf %156, %159 : vector<16x1xf32>
    %161 = math.rsqrt %160 : vector<16x1xf32>
    %162 = vector.broadcast %161 : vector<16x1xf32> to vector<16x32xf32>
    %163 = arith.mulf %158, %162 : vector<16x32xf32>
    %c0_56 = arith.constant 0 : index
    %c0_57 = arith.constant 0 : index
    %164 = vector.load %arg12[%c0_56, %c0_57] : memref<1x32xf32, #tpu.memory_space<vmem>>, vector<1x32xf32>
    %165 = vector.broadcast %164 : vector<1x32xf32> to vector<16x32xf32>
    %166 = arith.mulf %163, %165 : vector<16x32xf32>
    %c0_58 = arith.constant 0 : index
    %c0_59 = arith.constant 0 : index
    %167 = vector.load %arg13[%c0_58, %c0_59] : memref<1x32xf32, #tpu.memory_space<vmem>>, vector<1x32xf32>
    %168 = vector.broadcast %167 : vector<1x32xf32> to vector<16x32xf32>
    %169 = arith.addf %166, %168 : vector<16x32xf32>
    %170 = arith.truncf %169 : vector<16x32xf32> to vector<16x32xbf16>
    %c0_60 = arith.constant 0 : index
    %c0_61 = arith.constant 0 : index
    %171 = vector.load %arg14[%c0_60, %c0_61] : memref<32x32xbf16, #tpu.memory_space<vmem>>, vector<32x32xbf16>
    %cst_62 = arith.constant dense<0.000000e+00> : vector<16x32xf32>
    %172 = tpu.matmul %170, %171, %cst_62 {dimension_numbers = #tpu.dot_dimension_numbers<[1], [0], [0], [1], [0, 0, 1, 1], [], []>} : vector<16x32xbf16>, vector<32x32xbf16>, vector<16x32xf32> -> vector<16x32xf32>
    %c0_63 = arith.constant 0 : index
    %c0_64 = arith.constant 0 : index
    %173 = vector.load %arg15[%c0_63, %c0_64] : memref<1x32xf32, #tpu.memory_space<vmem>>, vector<1x32xf32>
    %174 = vector.broadcast %173 : vector<1x32xf32> to vector<16x32xf32>
    %175 = arith.addf %172, %174 : vector<16x32xf32>
    %176 = arith.addf %169, %175 : vector<16x32xf32>
    %cst_65 = arith.constant 0.000000e+00 : f32
    %177 = vector.broadcast %cst_65 : f32 to vector<16x32xf32>
    %178 = arith.maximumf %176, %177 : vector<16x32xf32>
    %179 = vector.shape_cast %178 : vector<16x32xf32> to vector<2x8x32xf32>
    %c0_66 = arith.constant 0 : index
    %c0_67 = arith.constant 0 : index
    %c0_68 = arith.constant 0 : index
    %180 = vector.load %arg16[%c0_66, %c0_67, %c0_68] : memref<2x8x32xf32, #tpu.memory_space<vmem>>, vector<2x8x32xf32>
    tpu.vector_store %arg16[%c0_66, %c0_67, %c0_68], %179 {strides = array<i32>} : memref<2x8x32xf32, #tpu.memory_space<vmem>>, vector<2x8x32xf32>,
    return
  }
  func.func @transform_0(%arg0: i32) -> (i32, i32, i32) {
    %c0_i32 = arith.constant 0 : i32
    %c0_i32_0 = arith.constant 0 : i32
    %c0_i32_1 = arith.constant 0 : i32
    return %arg0, %c0_i32, %c0_i32_0 : i32, i32, i32
  }
  func.func @transform_1(%arg0: i32) -> (i32, i32) {
    %c0_i32 = arith.constant 0 : i32
    %c0_i32_0 = arith.constant 0 : i32
    %c0_i32_1 = arith.constant 0 : i32
    return %c0_i32, %c0_i32_0 : i32, i32
  }
  func.func @transform_2(%arg0: i32) -> (i32, i32) {
    %c0_i32 = arith.constant 0 : i32
    %c0_i32_0 = arith.constant 0 : i32
    %c0_i32_1 = arith.constant 0 : i32
    return %c0_i32, %c0_i32_0 : i32, i32
  }
  func.func @transform_3(%arg0: i32) -> (i32, i32) {
    %c0_i32 = arith.constant 0 : i32
    %c0_i32_0 = arith.constant 0 : i32
    %c0_i32_1 = arith.constant 0 : i32
    return %c0_i32, %c0_i32_0 : i32, i32
  }
  func.func @transform_4(%arg0: i32) -> (i32, i32) {
    %c0_i32 = arith.constant 0 : i32
    %c0_i32_0 = arith.constant 0 : i32
    %c0_i32_1 = arith.constant 0 : i32
    return %c0_i32, %c0_i32_0 : i32, i32
  }
  func.func @transform_5(%arg0: i32) -> (i32, i32) {
    %c0_i32 = arith.constant 0 : i32
    %c0_i32_0 = arith.constant 0 : i32
    %c0_i32_1 = arith.constant 0 : i32
    return %c0_i32, %c0_i32_0 : i32, i32
  }
  func.func @transform_6(%arg0: i32) -> (i32, i32) {
    %c0_i32 = arith.constant 0 : i32
    %c0_i32_0 = arith.constant 0 : i32
    %c0_i32_1 = arith.constant 0 : i32
    return %c0_i32, %c0_i32_0 : i32, i32
  }
  func.func @transform_7(%arg0: i32) -> (i32, i32) {
    %c0_i32 = arith.constant 0 : i32
    %c0_i32_0 = arith.constant 0 : i32
    %c0_i32_1 = arith.constant 0 : i32
    return %c0_i32, %c0_i32_0 : i32, i32
  }
  func.func @transform_8(%arg0: i32) -> (i32, i32) {
    %c0_i32 = arith.constant 0 : i32
    %c0_i32_0 = arith.constant 0 : i32
    %c0_i32_1 = arith.constant 0 : i32
    return %c0_i32, %c0_i32_0 : i32, i32
  }
  func.func @transform_9(%arg0: i32) -> (i32, i32) {
    %c0_i32 = arith.constant 0 : i32
    %c0_i32_0 = arith.constant 0 : i32
    %c0_i32_1 = arith.constant 0 : i32
    return %c0_i32, %c0_i32_0 : i32, i32
  }
  func.func @transform_10(%arg0: i32) -> (i32, i32) {
    %c0_i32 = arith.constant 0 : i32
    %c0_i32_0 = arith.constant 0 : i32
    %c0_i32_1 = arith.constant 0 : i32
    return %c0_i32, %c0_i32_0 : i32, i32
  }
  func.func @transform_11(%arg0: i32) -> (i32, i32) {
    %c0_i32 = arith.constant 0 : i32
    %c0_i32_0 = arith.constant 0 : i32
    %c0_i32_1 = arith.constant 0 : i32
    return %c0_i32, %c0_i32_0 : i32, i32
  }
  func.func @transform_12(%arg0: i32) -> (i32, i32) {
    %c0_i32 = arith.constant 0 : i32
    %c0_i32_0 = arith.constant 0 : i32
    %c0_i32_1 = arith.constant 0 : i32
    return %c0_i32, %c0_i32_0 : i32, i32
  }
  func.func @transform_13(%arg0: i32) -> (i32, i32) {
    %c0_i32 = arith.constant 0 : i32
    %c0_i32_0 = arith.constant 0 : i32
    %c0_i32_1 = arith.constant 0 : i32
    return %c0_i32, %c0_i32_0 : i32, i32
  }
  func.func @transform_14(%arg0: i32) -> (i32, i32) {
    %c0_i32 = arith.constant 0 : i32
    %c0_i32_0 = arith.constant 0 : i32
    %c0_i32_1 = arith.constant 0 : i32
    return %c0_i32, %c0_i32_0 : i32, i32
  }
  func.func @transform_15(%arg0: i32) -> (i32, i32, i32) {
    %c0_i32 = arith.constant 0 : i32
    %c0_i32_0 = arith.constant 0 : i32
    %c0_i32_1 = arith.constant 0 : i32
    return %arg0, %c0_i32, %c0_i32_0 : i32, i32, i32
  }
}

</mosaic_0001>

<bundles_post_ra>
// kernel: tpu_custom_call.1
= control target key start
LH: loop header
LB: loop body
LE: loop exit
PB: predicated region body
PF: predicated region fallthrough
CT: control target
= control target key end

     0   :  { %20 = vsyncpa [#allocation3], 0  ;;  %s2386_s0 = inlined_call_operand.vmem [shape: f32[2,8,32], index: 0, kind: input, shape index: {}]   ;;  %s2387_s1 = inlined_call_operand.vmem [shape: bf16[32,96], index: 1, kind: input, shape index: {}]   ;;  %s2388_s2 = inlined_call_operand.hbm [shape: f32[1,96], index: 2, kind: input, shape index: {}]   ;;  %s2389_s3 = inlined_call_operand.vmem [shape: bf16[32,32], index: 3, kind: input, shape index: {}]   ;;  %s2390_s4 = inlined_call_operand.hbm [shape: f32[1,32], index: 4, kind: input, shape index: {}]   ;;  %s2391_s5 = inlined_call_operand.hbm [shape: f32[1,32], index: 5, kind: input, shape index: {}]   ;;  %s2392_s6 = inlined_call_operand.hbm [shape: f32[1,32], index: 6, kind: input, shape index: {}]   ;;  %s2393_s7 = inlined_call_operand.vmem [shape: bf16[32,128], index: 7, kind: input, shape index: {}]   ;;  %s2394_s8 = inlined_call_operand.hbm [shape: f32[1,128], index: 8, kind: input, shape index: {}]   ;;  %s2395_s9 = inlined_call_operand.vmem [shape: bf16[128,32], index: 9, kind: input, shape index: {}]   ;;  %s2396_s10 = inlined_call_operand.vmem [shape: f32[1,32], index: 10, kind: input, shape index: {}]   ;;  %s2397_s11 = inlined_call_operand.vmem [shape: f32[1,32], index: 11, kind: input, shape index: {}]   ;;  %s2398_s12 = inlined_call_operand.vmem [shape: f32[1,32], index: 12, kind: input, shape index: {}]   ;;  %s2399_s13 = inlined_call_operand.vmem [shape: bf16[32,32], index: 13, kind: input, shape index: {}]   ;;  %s2400_s14 = inlined_call_operand.vmem [shape: f32[1,32], index: 14, kind: input, shape index: {}]   ;;  %s2401_s15 = inlined_call_operand.hbm [shape: f32[2,8,32], index: 15, kind: output, shape index: {}]  }
   0x1   :  { %21 = vsyncpa [#allocation6], 0 }
   0x2   :  { %22 = vsyncpa [#allocation9], 0 }
   0x3   :  { %23 = vsyncpa [#allocation4], 0  ;;  %s2008_s18 = smov [#allocation5]   ;;  %s2009_s20 = smov [#allocation8]  }
   0x4   :  { %s46_s19 = sshll.u32 %s2008_s18, 4  ;;  %s66_s21 = sshll.u32 %s2009_s20, 4  ;;  %s47_s19 = int_to_ptr.vmem [resolvable:$true] %s46_s19  ;;  %s67_s21 = int_to_ptr.vmem [resolvable:$true] %s66_s21 }
   0x5   :  { %s1888_s22 = scalar_lea.vmem %s47_s19, 16  ;;  %s1892_s23 = scalar_lea.vmem %s47_s19, 32 }
   0x6   :  { %p1889_p0 = scmp.ne.s32.totalorder %s47_s19, %s1888_s22  ;;  %p1893_p1 = scmp.lt.s32.totalorder %s47_s19, %s47_s19 }
   0x7   :  { %p1894_p2 = scmp.lt.s32.totalorder %s1892_s23, %s1888_s22 }
   0x9   :  { %p1895_p3 = por %p1894_p2, %p1893_p1 }
   0xb   :  { %p1896_p4 = pnand %p1895_p3, %p1889_p0 }
   0xd   :  { %1899 = shalt.err (!%p1896_p4)
}
   0xe   :  { %49 = dma.hbm_to_vmem [thread:$0]  %s2390_s4, 16, %s47_s19, [#allocation6]  }
   0xf   :  { %s1908_s26 = scalar_lea.vmem %s67_s21, 16  ;;  %s1912_s27 = scalar_lea.vmem %s67_s21, 32 }
  0x10   :  { %p1909_p5 = scmp.ne.s32.totalorder %s67_s21, %s1908_s26  ;;  %p1913_p6 = scmp.lt.s32.totalorder %s67_s21, %s67_s21 }
  0x11   :  { %p1914_p7 = scmp.lt.s32.totalorder %s1912_s27, %s1908_s26 }
  0x13   :  { %p1915_p8 = por %p1914_p7, %p1913_p6 }
  0x15   :  { %p1916_p9 = pnand %p1915_p8, %p1909_p5 }
  0x17   :  { %1919 = shalt.err (!%p1916_p9)
}
  0x18   :  { %69 = dma.hbm_to_vmem [thread:$0]  %s2392_s6, 16, %s67_s21, [#allocation9]  }
  0x19   :  { %s2010_s30 = smov [#allocation2]   ;;  %s2011_s17 = smov [#allocation7]  }
  0x1a   :  { %s34_s16 = sshll.u32 %s2010_s30, 4  ;;  %s56_s18 = sshll.u32 %s2011_s17, 4  ;;  %s35_s16 = int_to_ptr.vmem [resolvable:$true] %s34_s16  ;;  %s57_s18 = int_to_ptr.vmem [resolvable:$true] %s56_s18 }
  0x1b   :  { %s1928_s20 = scalar_lea.vmem %s35_s16, 16  ;;  %s1932_s4 = scalar_lea.vmem %s35_s16, 32 }
  0x1c   :  { %p1929_p10 = scmp.ne.s32.totalorder %s35_s16, %s1928_s20  ;;  %p1933_p11 = scmp.lt.s32.totalorder %s35_s16, %s35_s16 }
  0x1d   :  { %p1934_p12 = scmp.lt.s32.totalorder %s1932_s4, %s1928_s20 }
  0x1f   :  { %p1935_p13 = por %p1934_p12, %p1933_p11 }
  0x21   :  { %p1936_p0 = pnand %p1935_p13, %p1929_p10 }
  0x23   :  { %1939 = shalt.err (!%p1936_p0)
}
  0x24   :  { %37 = dma.hbm_to_vmem [thread:$0]  %s2388_s2, 16, %s35_s16, [#allocation3]  }
  0x25   :  { %s1948_s23 = scalar_lea.vmem %s57_s18, 16  ;;  %s1952_s6 = scalar_lea.vmem %s57_s18, 32 }
  0x26   :  { %p1949_p1 = scmp.ne.s32.totalorder %s57_s18, %s1948_s23  ;;  %p1953_p2 = scmp.lt.s32.totalorder %s57_s18, %s57_s18 }
  0x27   :  { %p1954_p3 = scmp.lt.s32.totalorder %s1952_s6, %s1948_s23 }
  0x29   :  { %p1955_p4 = por %p1954_p3, %p1953_p2 }
  0x2b   :  { %p1956_p5 = pnand %p1955_p4, %p1949_p1 }
  0x2d   :  { %1959 = shalt.err (!%p1956_p5)
}
  0x2e   :  { %59 = dma.hbm_to_vmem [thread:$0]  %s2391_s5, 16, %s57_s18, [#allocation6]  }
  0x2f   :  { %s2012_s25 = smov [#allocation10]  }
  0x30   :  { %s78_s26 = sshll.u32 %s2012_s25, 4  ;;  %s79_s26 = int_to_ptr.vmem [resolvable:$true] %s78_s26 }
  0x31   :  { %s1968_s27 = scalar_lea.vmem %s79_s26, 16  ;;  %s1972_s28 = scalar_lea.vmem %s79_s26, 32 }
  0x32   :  { %p1969_p6 = scmp.ne.s32.totalorder %s79_s26, %s1968_s27  ;;  %p1973_p7 = scmp.lt.s32.totalorder %s79_s26, %s79_s26 }
  0x33   :  { %p1974_p8 = scmp.lt.s32.totalorder %s1972_s28, %s1968_s27 }
  0x35   :  { %p1975_p9 = por %p1974_p8, %p1973_p7 }
  0x37   :  { %p1976_p10 = pnand %p1975_p9, %p1969_p6 }
  0x39   :  { %1979 = shalt.err (!%p1976_p10)
}
  0x3a   :  { %81 = dma.hbm_to_vmem [thread:$0]  %s2394_s8, 16, %s79_s26, [#allocation9]  }
  0x3b   :  { %2000 = dma.done.wait [#allocation3], 16  }
  0x3c   :  { %2001 = vsyncadd [#allocation3], 4294967280 }
  0x3d   :  { %2002 = dma.done.wait [#allocation6], 32  }
  0x3e   :  { %2003 = vsyncadd [#allocation6], 4294967264 }
  0x3f   :  { %2004 = dma.done.wait [#allocation9], 32  }
  0x40   :  { %2005 = vsyncadd [#allocation9], 4294967264  ;;  %v2013_v0 = vmov 0.0   ;;  %vm2014_vm0 = vmmov 0   ;;  %v1824_v1 = vld [vmem:[%s2387_s1 + $0x8] sm:$0xff]   ;;  %v1825_v2 = vld [vmem:[%s2387_s1] sm:$0xff]  }
  0x41   :  { %1638 = vmatprep.subr.bf16.mxu0 %v2013_v0  ;;  %1642 = vmatprep.mubr.msk.bf16.mxu0 %vm2014_vm0, %v2013_v0  ;;  %v2141_v3 = vld [vmem:[%s2386_s0] sm:$0xff]  ;;  %v2146_v4 = vld [vmem:[%s2386_s0 + $0x8] sm:$0xff]  ;;  %vm136_vm1 = vcmask 261120   ;;  %s2015_s0 = smov 96   ;;  %vm186_vm2 = vcmask 64512   ;;  %s2016_s1 = smov 64  }
  0x42   :  { %1658 = vmatprep.subr.bf16.mxu1 %v2013_v0  ;;  %1660 = vmatprep.mubr.msk.bf16.mxu1 %vm2014_vm0, %v2013_v0  ;;  %v112_v5 = vpack.c.bf16 %v2146_v4, %v2141_v3  ;;  %v1540_v6 = vld [vmem:[#allocation2] ss:$0 sm:$0xff]  ;;  %s2017_s19 = smov 88   ;;  %vm313_vm3 = vcmask 1043456   ;;  %s2018_s22 = smov 120   ;;  %vm1097_vm4 = vcmask 130048  }
  0x43   :  { %1639 = vmatpush3.bf16.msra.mxu0 %v1824_v1  ;;  %s2019_s23 = smov 56   ;;  %s2020_s6 = smov 80   ;;  %vm1100_vm5 = vcmask 195584  }
  0x44   :  { %1640 = vmatprep.subr.bf16.mxu0 %v2013_v0  ;;  %s2021_s21 = smov 112   ;;  %s2022_s24 = smov 48  }
  0x45   :  { %s2023_s25 = smov 72   ;;  %s2024_s26 = smov 104  }
  0x46   :  { %s2025_s27 = smov 40   ;;  %s2026_s28 = smov 8  }
  0x47   :  { %1641 = vmatpush3.bf16.msra.mxu0 %v1825_v2  ;;  %s2027_s2 = smov 16   ;;  %s2028_s16 = smov 24  }
  0x48   :  { %1646 = vmatprep.subr.bf16.mxu0 %v2013_v0 }
  0x4a   :  { %1643 = vmatmul.mubr.msk.bf16.vlgmr.msra.gmra.mxu0 %vm136_vm1, %v112_v5 }
  0x4b   :  { %1648 = vmatprep.mubr.msk.bf16.mxu0 %vm2014_vm0, %v2013_v0 }
 0x10a   :  { %v174_v7 = vpop.f32.mrf.mxu0 }
 0x10b   :  { %v175_v8 = vadd.f32 %v1540_v6, %v174_v7 }
 0x10c   :  { %v1644_v9 = vpop.f32.mrf.mxu0 }
 0x10d   :  { %v2155_v10 = vpack.c.bf16 %v175_v8, %v175_v8 }
 0x10e   :  { %v177_v11 = vpop.f32.mrf.mxu0 }
 0x10f   :  { %v178_v12 = vadd.f32 %v1540_v6, %v177_v11  ;;  %184 = vrot.lane.b32.xlu0 %v2155_v10, %s2015_s0 }
 0x110   :  { %v1645_v13 = vpop.f32.mrf.mxu0 }
 0x111   :  { %v2158_v14 = vpack.c.bf16 %v178_v12, %v178_v12 }
 0x113   :  { %234 = vrot.lane.b32.xlu0 %v2158_v14, %s2015_s0 }
 0x181   :  { %v185_v15 = vpop.permute.xlu0 %184 }
 0x182   :  { %v191_v16 = vsel %vm186_vm2, %v185_v15, 0 }
 0x183   :  { %1647 = vmatpush3.bf16.xpose.msra.mxu0 %v191_v16 }
 0x184   :  { %1652 = vmatprep.subr.bf16.mxu0 %v2013_v0 }
 0x185   :  { %v235_v17 = vpop.permute.xlu0 %234 }
 0x186   :  { %v240_v18 = vsel %vm186_vm2, %v235_v17, 0 }
 0x18a   :  { %1649 = vmatmul.mubr.msk.bf16.vlgmr.msra.gmra.mxu0 %vm186_vm2, %v2155_v10 }
 0x18b   :  { %1653 = vmatpush3.bf16.xpose.msra.mxu0 %v240_v18  ;;  %1654 = vmatprep.mubr.msk.bf16.mxu0 %vm2014_vm0, %v2013_v0 }
 0x18c   :  { %1664 = vmatprep.subr.bf16.mxu0 %v2013_v0 }
 0x192   :  { %1655 = vmatmul.mubr.msk.bf16.vlgmr.msra.gmra.mxu0 %vm186_vm2, %v2158_v14 }
 0x193   :  { %1666 = vmatprep.mubr.msk.bf16.mxu0 %vm2014_vm0, %v2013_v0 }
 0x24a   :  { %v227_v19 = vpop.f32.mrf.mxu0 }
 0x24b   :  { %v282_v20 = vmul.f32 0.35355338, %v227_v19 }
 0x24c   :  { %v1650_v21 = vpop.f32.mrf.mxu0 }
 0x24d   :  { %v284_v22 = vsel %vm186_vm2, %v282_v20, -inf }
 0x24e   :  { %285 = vmax.xlane.f32.xlu1 %v284_v22  ;;  %v230_v23 = vpop.f32.mrf.mxu0 }
 0x250   :  { %v1651_v24 = vpop.f32.mrf.mxu0 }
 0x252   :  { %v276_v25 = vpop.f32.mrf.mxu0 }
 0x253   :  { %v283_v26 = vmul.f32 0.35355338, %v276_v25 }
 0x254   :  { %v1656_v27 = vpop.f32.mrf.mxu0 }
 0x255   :  { %v287_v28 = vsel %vm186_vm2, %v283_v26, -inf }
 0x256   :  { %288 = vmax.xlane.f32.xlu1 %v287_v28  ;;  %v279_v29 = vpop.f32.mrf.mxu0 }
 0x258   :  { %v1657_v30 = vpop.f32.mrf.mxu0 }
 0x267   :  { %308 = vrot.lane.b32.xlu1 %v2155_v10, %s2016_s1 }
 0x26b   :  { %357 = vrot.lane.b32.xlu1 %v2158_v14, %s2016_s1 }
 0x26f   :  { %407 = vrot.lane.b32.xlu1 %v2155_v10, %s2017_s19 }
 0x2d7   :  { %v286_v31 = vpop.xlane.xlu1 %285 }
 0x2d8   :  { %v290_v32 = vsub.f32 %v282_v20, %v286_v31 }
 0x2da   :  { %v292_v33 = vmul.f32 1.442695, %v290_v32 }
 0x2dc   :  { %1840 = vpow2.f32 %v292_v33 }
 0x2df   :  { %v289_v34 = vpop.xlane.xlu1 %288 }
 0x2e0   :  { %v291_v35 = vsub.f32 %v283_v26, %v289_v34 }
 0x2e2   :  { %v294_v36 = vmul.f32 1.442695, %v291_v35 }
 0x2e3   :  { %v309_v37 = vpop.permute.xlu1 %308 }
 0x2e4   :  { %1842 = vpow2.f32 %v294_v36  ;;  %v315_v38 = vsel %vm313_vm3, %v309_v37, 0 }
 0x2e5   :  { %1659 = vmatpush3.bf16.msra.mxu1 %v315_v38 }
 0x2e6   :  { %1670 = vmatprep.subr.bf16.mxu1 %v2013_v0 }
 0x2e7   :  { %v358_v39 = vpop.permute.xlu1 %357 }
 0x2e8   :  { %v363_v40 = vsel %vm313_vm3, %v358_v39, 0 }
 0x2e9   :  { %v1841_v41 = vpop.eup %1840  ;;  %1665 = vmatpush3.bf16.msra.mxu0 %v363_v40 }
 0x2ea   :  { %v296_v42 = vsel %vm186_vm2, %v1841_v41, 0.0  ;;  %1676 = vmatprep.subr.bf16.mxu0 %v2013_v0 }
 0x2eb   :  { %297 = vadd.xlane.f32.xlu0 %v296_v42  ;;  %v408_v46 = vpop.permute.xlu1 %407 }
 0x2ec   :  { %v413_v51 = vsel %vm186_vm2, %v408_v46, 0 }
 0x2f1   :  { %v1843_v43 = vpop.eup %1842 }
 0x2f2   :  { %v299_v44 = vsel %vm186_vm2, %v1843_v43, 0.0 }
 0x2f3   :  { %300 = vadd.xlane.f32.xlu1 %v299_v44 }
 0x301   :  { %405 = vrot.lane.b32.xlu0 %v2155_v10, %s2018_s22 }
 0x304   :  { %457 = vrot.lane.b32.xlu1 %v2158_v14, %s2017_s19 }
 0x308   :  { %455 = vrot.lane.b32.xlu1 %v2158_v14, %s2018_s22 }
 0x374   :  { %v298_v45 = vpop.xlane.xlu0 %297 }
 0x375   :  { %1844 = vrcp.f32 %v298_v45 }
 0x378   :  { %v406_v56 = vpop.permute.xlu0 %405 }
 0x37c   :  { %v301_v47 = vpop.xlane.xlu1 %300 }
 0x37d   :  { %1846 = vrcp.f32 %v301_v47 }
 0x380   :  { %v458_v54 = vpop.permute.xlu1 %457 }
 0x381   :  { %v463_v57 = vsel %vm186_vm2, %v458_v54, 0 }
 0x382   :  { %v1845_v48 = vpop.eup %1844 }
 0x383   :  { %v304_v49 = vmul.f32 %v1845_v48, %v1841_v41 }
 0x384   :  { %v456_v58 = vpop.permute.xlu1 %455 }
 0x385   :  { %v306_v50 = vpack.c.bf16 %v304_v49, %v304_v49 }
 0x387   :  { %1661 = vmatmul.mubr.msk.bf16.vlgmr.msra.gmra.mxu1 %vm186_vm2, %v306_v50 }
 0x388   :  { %1671 = vmatpush3.bf16.xpose.msra.mxu1 %v413_v51  ;;  %1672 = vmatprep.mubr.msk.bf16.mxu1 %vm2014_vm0, %v2013_v0 }
 0x389   :  { %1682 = vmatprep.subr.bf16.mxu1 %v2013_v0 }
 0x38a   :  { %v1847_v52 = vpop.eup %1846 }
 0x38b   :  { %v305_v53 = vmul.f32 %v1847_v52, %v1843_v43 }
 0x38d   :  { %v307_v55 = vpack.c.bf16 %v305_v53, %v305_v53 }
 0x38f   :  { %1667 = vmatmul.mubr.msk.bf16.vlgmr.msra.gmra.mxu0 %vm186_vm2, %v307_v55  ;;  %1673 = vmatmul.mubr.msk.bf16.vlgmr.msra.gmra.mxu1 %vm186_vm2, %v406_v56 }
 0x390   :  { %1677 = vmatpush3.bf16.xpose.msra.mxu0 %v463_v57  ;;  %1678 = vmatprep.mubr.msk.bf16.mxu0 %vm2014_vm0, %v2013_v0 }
 0x391   :  { %1688 = vmatprep.subr.bf16.mxu0 %v2013_v0  ;;  %1684 = vmatprep.mubr.msk.bf16.mxu1 %vm2014_vm0, %v2013_v0 }
 0x397   :  { %1679 = vmatmul.mubr.msk.bf16.vlgmr.msra.gmra.mxu0 %vm186_vm2, %v456_v58 }
 0x398   :  { %1690 = vmatprep.mubr.msk.bf16.mxu0 %vm2014_vm0, %v2013_v0 }
 0x447   :  { %v2203_v59 = vpop.f32.mrf.mxu1 }
 0x449   :  { %v1662_v60 = vpop.f32.mrf.mxu1 }
 0x44b   :  { %v354_v61 = vpop.f32.mrf.mxu1 }
 0x44d   :  { %v1663_v62 = vpop.f32.mrf.mxu1 }
 0x44f   :  { %v2205_v63 = vpop.f32.mrf.mxu0  ;;  %v449_v1 = vpop.f32.mrf.mxu1 }
 0x450   :  { %v505_v2 = vmul.f32 0.35355338, %v449_v1 }
 0x451   :  { %v1668_v5 = vpop.f32.mrf.mxu0  ;;  %v1674_v6 = vpop.f32.mrf.mxu1 }
 0x452   :  { %v507_v7 = vsel %vm186_vm2, %v505_v2, -inf }
 0x453   :  { %508 = vmax.xlane.f32.xlu1 %v507_v7  ;;  %v402_v8 = vpop.f32.mrf.mxu0  ;;  %v452_v9 = vpop.f32.mrf.mxu1 }
 0x455   :  { %v1669_v11 = vpop.f32.mrf.mxu0  ;;  %v1675_v12 = vpop.f32.mrf.mxu1 }
 0x457   :  { %v499_v13 = vpop.f32.mrf.mxu0 }
 0x458   :  { %v506_v15 = vmul.f32 0.35355338, %v499_v13 }
 0x459   :  { %v1680_v16 = vpop.f32.mrf.mxu0 }
 0x45a   :  { %v510_v17 = vsel %vm186_vm2, %v506_v15, -inf }
 0x45b   :  { %511 = vmax.xlane.f32.xlu0 %v510_v17  ;;  %v502_v18 = vpop.f32.mrf.mxu0 }
 0x45d   :  { %v1681_v19 = vpop.f32.mrf.mxu0 }
 0x464   :  { %531 = vrot.lane.b32.xlu1 %v2155_v10, %s2019_s23 }
 0x468   :  { %629 = vrot.lane.b32.xlu1 %v2155_v10, %s2020_s6 }
 0x471   :  { %579 = vrot.lane.b32.xlu0 %v2158_v14, %s2019_s23 }
 0x475   :  { %627 = vrot.lane.b32.xlu0 %v2155_v10, %s2021_s21 }
 0x4dc   :  { %v509_v20 = vpop.xlane.xlu1 %508 }
 0x4dd   :  { %v513_v21 = vsub.f32 %v505_v2, %v509_v20 }
 0x4df   :  { %v515_v22 = vmul.f32 1.442695, %v513_v21 }
 0x4e0   :  { %v532_v23 = vpop.permute.xlu1 %531 }
 0x4e1   :  { %1848 = vpow2.f32 %v515_v22  ;;  %v537_v24 = vsel %vm313_vm3, %v532_v23, 0 }
 0x4e2   :  { %1683 = vmatpush3.bf16.msra.mxu1 %v537_v24 }
 0x4e3   :  { %1694 = vmatprep.subr.bf16.mxu1 %v2013_v0 }
 0x4e4   :  { %v512_v25 = vpop.xlane.xlu0 %511  ;;  %v630_v34 = vpop.permute.xlu1 %629 }
 0x4e5   :  { %v514_v26 = vsub.f32 %v506_v15, %v512_v25  ;;  %v635_v40 = vsel %vm186_vm2, %v630_v34, 0 }
 0x4e7   :  { %v517_v27 = vmul.f32 1.442695, %v514_v26 }
 0x4e8   :  { %v580_v28 = vpop.permute.xlu0 %579 }
 0x4e9   :  { %1850 = vpow2.f32 %v517_v27  ;;  %v585_v29 = vsel %vm313_vm3, %v580_v28, 0 }
 0x4ea   :  { %1689 = vmatpush3.bf16.msra.mxu0 %v585_v29 }
 0x4eb   :  { %1700 = vmatprep.subr.bf16.mxu0 %v2013_v0 }
 0x4ec   :  { %v628_v45 = vpop.permute.xlu0 %627 }
 0x4ee   :  { %v1849_v30 = vpop.eup %1848 }
 0x4ef   :  { %v519_v31 = vsel %vm186_vm2, %v1849_v30, 0.0 }
 0x4f0   :  { %520 = vadd.xlane.f32.xlu1 %v519_v31 }
 0x4f6   :  { %v1851_v32 = vpop.eup %1850 }
 0x4f7   :  { %v522_v33 = vsel %vm186_vm2, %v1851_v32, 0.0 }
 0x4f8   :  { %523 = vadd.xlane.f32.xlu1 %v522_v33 }
 0x509   :  { %679 = vrot.lane.b32.xlu1 %v2158_v14, %s2020_s6 }
 0x50d   :  { %677 = vrot.lane.b32.xlu1 %v2158_v14, %s2021_s21 }
 0x579   :  { %v521_v35 = vpop.xlane.xlu1 %520 }
 0x57a   :  { %1852 = vrcp.f32 %v521_v35 }
 0x581   :  { %v524_v36 = vpop.xlane.xlu1 %523 }
 0x582   :  { %1854 = vrcp.f32 %v524_v36 }
 0x585   :  { %v680_v43 = vpop.permute.xlu1 %679 }
 0x586   :  { %v685_v46 = vsel %vm186_vm2, %v680_v43, 0 }
 0x587   :  { %v1853_v37 = vpop.eup %1852 }
 0x588   :  { %v527_v38 = vmul.f32 %v1853_v37, %v1849_v30 }
 0x589   :  { %v678_v47 = vpop.permute.xlu1 %677 }
 0x58a   :  { %v529_v39 = vpack.c.bf16 %v527_v38, %v527_v38 }
 0x58c   :  { %1685 = vmatmul.mubr.msk.bf16.vlgmr.msra.gmra.mxu1 %vm186_vm2, %v529_v39 }
 0x58d   :  { %1695 = vmatpush3.bf16.xpose.msra.mxu1 %v635_v40  ;;  %1696 = vmatprep.mubr.msk.bf16.mxu1 %vm2014_vm0, %v2013_v0 }
 0x58e   :  { %1706 = vmatprep.subr.bf16.mxu1 %v2013_v0 }
 0x58f   :  { %v1855_v41 = vpop.eup %1854 }
 0x590   :  { %v528_v42 = vmul.f32 %v1855_v41, %v1851_v32 }
 0x592   :  { %v530_v44 = vpack.c.bf16 %v528_v42, %v528_v42 }
 0x594   :  { %1691 = vmatmul.mubr.msk.bf16.vlgmr.msra.gmra.mxu0 %vm186_vm2, %v530_v44  ;;  %1697 = vmatmul.mubr.msk.bf16.vlgmr.msra.gmra.mxu1 %vm186_vm2, %v628_v45 }
 0x595   :  { %1701 = vmatpush3.bf16.xpose.msra.mxu0 %v685_v46  ;;  %1702 = vmatprep.mubr.msk.bf16.mxu0 %vm2014_vm0, %v2013_v0 }
 0x596   :  { %1712 = vmatprep.subr.bf16.mxu0 %v2013_v0  ;;  %1708 = vmatprep.mubr.msk.bf16.mxu1 %vm2014_vm0, %v2013_v0 }
 0x59c   :  { %1703 = vmatmul.mubr.msk.bf16.vlgmr.msra.gmra.mxu0 %vm186_vm2, %v678_v47 }
 0x59d   :  { %1714 = vmatprep.mubr.msk.bf16.mxu0 %vm2014_vm0, %v2013_v0 }
 0x64c   :  { %v2237_v48 = vpop.f32.mrf.mxu1 }
 0x64e   :  { %v1686_v49 = vpop.f32.mrf.mxu1 }
 0x650   :  { %v576_v50 = vpop.f32.mrf.mxu1 }
 0x652   :  { %v1687_v51 = vpop.f32.mrf.mxu1 }
 0x654   :  { %v2239_v52 = vpop.f32.mrf.mxu0  ;;  %v671_v53 = vpop.f32.mrf.mxu1 }
 0x655   :  { %v1809_v54 = vpack.i.bf16 %v2239_v52, %v2237_v48  ;;  %v727_v55 = vmul.f32 0.35355338, %v671_v53 }
 0x656   :  { %v1692_v56 = vpop.f32.mrf.mxu0  ;;  %v1698_v57 = vpop.f32.mrf.mxu1 }
 0x657   :  { %v729_v58 = vsel %vm186_vm2, %v727_v55, -inf }
 0x658   :  { %730 = vmax.xlane.f32.xlu0 %v729_v58  ;;  %v624_v60 = vpop.f32.mrf.mxu0  ;;  %v674_v61 = vpop.f32.mrf.mxu1 }
 0x65a   :  { %v1693_v62 = vpop.f32.mrf.mxu0  ;;  %v1699_v1 = vpop.f32.mrf.mxu1 }
 0x65c   :  { %v721_v2 = vpop.f32.mrf.mxu0 }
 0x65d   :  { %v728_v5 = vmul.f32 0.35355338, %v721_v2 }
 0x65e   :  { %v1704_v6 = vpop.f32.mrf.mxu0 }
 0x65f   :  { %v732_v7 = vsel %vm186_vm2, %v728_v5, -inf }
 0x660   :  { %733 = vmax.xlane.f32.xlu1 %v732_v7  ;;  %v724_v8 = vpop.f32.mrf.mxu0 }
 0x662   :  { %v1705_v9 = vpop.f32.mrf.mxu0 }
 0x671   :  { %753 = vrot.lane.b32.xlu1 %v2155_v10, %s2022_s24 }
 0x675   :  { %851 = vrot.lane.b32.xlu1 %v2155_v10, %s2023_s25 }
 0x679   :  { %901 = vrot.lane.b32.xlu1 %v2158_v14, %s2023_s25 }
 0x67d   :  { %899 = vrot.lane.b32.xlu1 %v2158_v14, %s2024_s26 }
 0x6e1   :  { %v731_v11 = vpop.xlane.xlu0 %730 }
 0x6e2   :  { %v735_v12 = vsub.f32 %v727_v55, %v731_v11 }
 0x6e4   :  { %v737_v13 = vmul.f32 1.442695, %v735_v12 }
 0x6e6   :  { %1856 = vpow2.f32 %v737_v13 }
 0x6e9   :  { %v734_v15 = vpop.xlane.xlu1 %733 }
 0x6ea   :  { %v736_v16 = vsub.f32 %v728_v5, %v734_v15 }
 0x6ec   :  { %v739_v17 = vmul.f32 1.442695, %v736_v16 }
 0x6ed   :  { %v754_v18 = vpop.permute.xlu1 %753 }
 0x6ee   :  { %1858 = vpow2.f32 %v739_v17  ;;  %v759_v19 = vsel %vm313_vm3, %v754_v18, 0 }
 0x6ef   :  { %1707 = vmatpush3.bf16.msra.mxu1 %v759_v19 }
 0x6f0   :  { %1718 = vmatprep.subr.bf16.mxu1 %v2013_v0 }
 0x6f1   :  { %v852_v30 = vpop.permute.xlu1 %851 }
 0x6f2   :  { %v857_v32 = vsel %vm186_vm2, %v852_v30, 0 }
 0x6f3   :  { %v1857_v20 = vpop.eup %1856 }
 0x6f4   :  { %v741_v21 = vsel %vm186_vm2, %v1857_v20, 0.0 }
 0x6f5   :  { %742 = vadd.xlane.f32.xlu0 %v741_v21  ;;  %v902_v35 = vpop.permute.xlu1 %901 }
 0x6f6   :  { %v907_v38 = vsel %vm186_vm2, %v902_v35, 0 }
 0x6f9   :  { %v900_v39 = vpop.permute.xlu1 %899 }
 0x6fb   :  { %v1859_v22 = vpop.eup %1858 }
 0x6fc   :  { %v744_v23 = vsel %vm186_vm2, %v1859_v22, 0.0 }
 0x6fd   :  { %745 = vadd.xlane.f32.xlu0 %v744_v23 }
 0x713   :  { %801 = vrot.lane.b32.xlu0 %v2158_v14, %s2022_s24 }
 0x717   :  { %849 = vrot.lane.b32.xlu0 %v2155_v10, %s2024_s26 }
 0x77e   :  { %v743_v24 = vpop.xlane.xlu0 %742 }
 0x77f   :  { %1860 = vrcp.f32 %v743_v24  ;;  %v1826_v24 = vld [vmem:[%s2389_s3 + $0x8] sm:$0xff]  }
 0x786   :  { %v746_v25 = vpop.xlane.xlu0 %745 }
 0x787   :  { %1862 = vrcp.f32 %v746_v25  ;;  %v1827_v25 = vld [vmem:[%s2389_s3] sm:$0xff]  }
 0x78a   :  { %v802_v26 = vpop.permute.xlu0 %801 }
 0x78b   :  { %v807_v27 = vsel %vm313_vm3, %v802_v26, 0 }
 0x78c   :  { %v1861_v28 = vpop.eup %1860  ;;  %1713 = vmatpush3.bf16.msra.mxu0 %v807_v27 }
 0x78d   :  { %v749_v29 = vmul.f32 %v1861_v28, %v1857_v20  ;;  %1724 = vmatprep.subr.bf16.mxu0 %v2013_v0 }
 0x78e   :  { %v850_v37 = vpop.permute.xlu0 %849 }
 0x78f   :  { %v751_v31 = vpack.c.bf16 %v749_v29, %v749_v29 }
 0x791   :  { %1709 = vmatmul.mubr.msk.bf16.vlgmr.msra.gmra.mxu1 %vm186_vm2, %v751_v31 }
 0x792   :  { %1719 = vmatpush3.bf16.xpose.msra.mxu1 %v857_v32  ;;  %1720 = vmatprep.mubr.msk.bf16.mxu1 %vm2014_vm0, %v2013_v0 }
 0x793   :  { %1730 = vmatprep.subr.bf16.mxu1 %v2013_v0 }
 0x794   :  { %v1863_v33 = vpop.eup %1862 }
 0x795   :  { %v750_v34 = vmul.f32 %v1863_v33, %v1859_v22 }
 0x797   :  { %v752_v36 = vpack.c.bf16 %v750_v34, %v750_v34 }
 0x799   :  { %1715 = vmatmul.mubr.msk.bf16.vlgmr.msra.gmra.mxu0 %vm186_vm2, %v752_v36  ;;  %1721 = vmatmul.mubr.msk.bf16.vlgmr.msra.gmra.mxu1 %vm186_vm2, %v850_v37 }
 0x79a   :  { %1725 = vmatpush3.bf16.xpose.msra.mxu0 %v907_v38  ;;  %1726 = vmatprep.mubr.msk.bf16.mxu0 %vm2014_vm0, %v2013_v0 }
 0x79b   :  { %1736 = vmatprep.subr.bf16.mxu0 %v2013_v0  ;;  %1732 = vmatprep.mubr.msk.bf16.mxu1 %vm2014_vm0, %v2013_v0 }
 0x7a1   :  { %1727 = vmatmul.mubr.msk.bf16.vlgmr.msra.gmra.mxu0 %vm186_vm2, %v900_v39 }
 0x7a2   :  { %1738 = vmatprep.mubr.msk.bf16.mxu0 %vm2014_vm0, %v2013_v0 }
 0x851   :  { %v795_v40 = vpop.f32.mrf.mxu1 }
 0x853   :  { %v1710_v41 = vpop.f32.mrf.mxu1 }
 0x855   :  { %v798_v42 = vpop.f32.mrf.mxu1 }
 0x857   :  { %v1711_v43 = vpop.f32.mrf.mxu1 }
 0x859   :  { %v843_v44 = vpop.f32.mrf.mxu0  ;;  %v893_v45 = vpop.f32.mrf.mxu1 }
 0x85a   :  { %v949_v46 = vmul.f32 0.35355338, %v893_v45  ;;  %v1814_v2 = vpack.i.bf16 %v843_v44, %v795_v40 }
 0x85b   :  { %v1716_v47 = vpop.f32.mrf.mxu0  ;;  %v1722_v49 = vpop.f32.mrf.mxu1 }
 0x85c   :  { %v951_v50 = vsel %vm186_vm2, %v949_v46, -inf }
 0x85d   :  { %952 = vmax.xlane.f32.xlu0 %v951_v50  ;;  %v846_v51 = vpop.f32.mrf.mxu0  ;;  %v896_v53 = vpop.f32.mrf.mxu1 }
 0x85e   :  { %v1560_v53 = vld [vmem:[#allocation5] ss:$0 sm:$0xff] }
 0x85f   :  { %v1717_v55 = vpop.f32.mrf.mxu0  ;;  %v1723_v56 = vpop.f32.mrf.mxu1 }
 0x861   :  { %v943_v57 = vpop.f32.mrf.mxu0 }
 0x862   :  { %v950_v58 = vmul.f32 0.35355338, %v943_v57 }
 0x863   :  { %v1728_v60 = vpop.f32.mrf.mxu0 }
 0x864   :  { %v954_v61 = vsel %vm186_vm2, %v950_v58, -inf }
 0x865   :  { %955 = vmax.xlane.f32.xlu1 %v954_v61  ;;  %v946_v62 = vpop.f32.mrf.mxu0 }
 0x867   :  { %v1729_v1 = vpop.f32.mrf.mxu0 }
 0x876   :  { %975 = vrot.lane.b32.xlu1 %v2155_v10, %s2025_s27 }
 0x87a   :  { %1810 = vrot.lane.b32.xlu1 %v1809_v54, %s2026_s28 }
 0x87e   :  { %1815 = vrot.lane.b32.xlu1 %v1814_v2, %s2027_s2 }
 0x8e6   :  { %v953_v5 = vpop.xlane.xlu0 %952 }
 0x8e7   :  { %v957_v6 = vsub.f32 %v949_v46, %v953_v5 }
 0x8e9   :  { %v959_v7 = vmul.f32 1.442695, %v957_v6 }
 0x8eb   :  { %1864 = vpow2.f32 %v959_v7 }
 0x8ee   :  { %v956_v8 = vpop.xlane.xlu1 %955 }
 0x8ef   :  { %v958_v9 = vsub.f32 %v950_v58, %v956_v8 }
 0x8f1   :  { %v961_v11 = vmul.f32 1.442695, %v958_v9 }
 0x8f2   :  { %v976_v12 = vpop.permute.xlu1 %975 }
 0x8f3   :  { %1866 = vpow2.f32 %v961_v11  ;;  %v981_v10 = vsel %vm313_vm3, %v976_v12, 0 }
 0x8f4   :  { %1731 = vmatpush3.bf16.msra.mxu1 %v981_v10 }
 0x8f5   :  { %1742 = vmatprep.subr.bf16.mxu1 %v2013_v0 }
 0x8f6   :  { %v1811_v35 = vpop.permute.xlu1 %1810 }
 0x8f7   :  { %v1813_v37 = vunpack.i.h.bf16 %v1811_v35  ;;  %v1812_v38 = vunpack.i.l.bf16 %v1811_v35  ;;  %v1837_v35 = vld [vmem:[%s2395_s9] sm:$0xff]  }
 0x8f8   :  { %v1865_v13 = vpop.eup %1864 }
 0x8f9   :  { %v963_v48 = vsel %vm186_vm2, %v1865_v13, 0.0  ;;  %v1096_v42 = vsel %vm186_vm2, %v2205_v63, %v1813_v37  ;;  %v1095_v43 = vsel %vm186_vm2, %v2203_v59, %v1812_v38 }
 0x8fa   :  { %964 = vadd.xlane.f32.xlu0 %v963_v48  ;;  %v1816_v36 = vpop.permute.xlu1 %1815  ;;  %v1830_v48 = vld [vmem:[%s2395_s9 + $0x38] sm:$0xff]  }
 0x8fb   :  { %v1818_v39 = vunpack.i.h.bf16 %v1816_v36  ;;  %v1817_v40 = vunpack.i.l.bf16 %v1816_v36  ;;  %v1566_v36 = vld [vmem:[#allocation10] ss:$0 sm:$0xff] }
 0x8fd   :  { %v1098_v46 = vsel %vm1097_vm4, %v1095_v43, %v1817_v40  ;;  %v1099_v47 = vsel %vm1097_vm4, %v1096_v42, %v1818_v39 }
 0x900   :  { %v1867_v52 = vpop.eup %1866 }
 0x901   :  { %v966_v54 = vsel %vm186_vm2, %v1867_v52, 0.0 }
 0x902   :  { %967 = vadd.xlane.f32.xlu0 %v966_v54  ;;  %v1832_v54 = vld [vmem:[%s2395_s9 + $0x28] sm:$0xff]  }
 0x918   :  { %1023 = vrot.lane.b32.xlu0 %v2158_v14, %s2025_s27 }
 0x983   :  { %v965_v15 = vpop.xlane.xlu0 %964 }
 0x984   :  { %1868 = vrcp.f32 %v965_v15  ;;  %v1833_v15 = vld [vmem:[%s2395_s9 + $0x20] sm:$0xff]  }
 0x98b   :  { %v968_v16 = vpop.xlane.xlu0 %967 }
 0x98c   :  { %1870 = vrcp.f32 %v968_v16  ;;  %v1834_v16 = vld [vmem:[%s2395_s9 + $0x18] sm:$0xff]  }
 0x98f   :  { %v1024_v17 = vpop.permute.xlu0 %1023 }
 0x990   :  { %v1029_v18 = vsel %vm313_vm3, %v1024_v17, 0 }
 0x991   :  { %v1869_v19 = vpop.eup %1868  ;;  %1737 = vmatpush3.bf16.msra.mxu0 %v1029_v18 }
 0x992   :  { %v971_v20 = vmul.f32 %v1869_v19, %v1865_v13  ;;  %1750 = vmatprep.subr.bf16.mxu0 %v2013_v0  ;;  %v1829_v13 = vld [vmem:[%s2393_s7] sm:$0xff]  }
 0x994   :  { %v973_v21 = vpack.c.bf16 %v971_v20, %v971_v20 }
 0x996   :  { %1733 = vmatmul.mubr.msk.bf16.vlgmr.msra.gmra.mxu1 %vm186_vm2, %v973_v21 }
 0x997   :  { %1746 = vmatprep.mubr.msk.bf16.mxu1 %vm2014_vm0, %v2013_v0  ;;  %1743 = vmatpush3.bf16.msra.mxu1 %v1826_v24  ;;  %v1564_v24 = vld [vmem:[#allocation7] ss:$0 sm:$0xff] }
 0x998   :  { %1744 = vmatprep.subr.bf16.mxu1 %v2013_v0 }
 0x999   :  { %v1871_v22 = vpop.eup %1870 }
 0x99a   :  { %v972_v14 = vmul.f32 %v1871_v22, %v1867_v52  ;;  %v1831_v52 = vld [vmem:[%s2395_s9 + $0x30] sm:$0xff]  }
 0x99b   :  { %1745 = vmatpush3.bf16.msra.mxu1 %v1827_v25 }
 0x99c   :  { %v974_v23 = vpack.c.bf16 %v972_v14, %v972_v14  ;;  %1758 = vmatprep.subr.bf16.mxu1 %v2013_v0 }
 0x99e   :  { %1739 = vmatmul.mubr.msk.bf16.vlgmr.msra.gmra.mxu0 %vm186_vm2, %v974_v23 }
 0x99f   :  { %1754 = vmatprep.mubr.msk.bf16.mxu0 %vm2014_vm0, %v2013_v0 }
 0xa56   :  { %v1017_v26 = vpop.f32.mrf.mxu1 }
 0xa58   :  { %v1734_v27 = vpop.f32.mrf.mxu1 }
 0xa5a   :  { %v1020_v28 = vpop.f32.mrf.mxu1 }
 0xa5b   :  { %v1565_v28 = vld [vmem:[#allocation8] ss:$0 sm:$0xff] }
 0xa5c   :  { %v1735_v29 = vpop.f32.mrf.mxu1 }
 0xa5e   :  { %v1065_v30 = vpop.f32.mrf.mxu0 }
 0xa5f   :  { %v1819_v31 = vpack.i.bf16 %v1065_v30, %v1017_v26 }
 0xa60   :  { %v1740_v32 = vpop.f32.mrf.mxu0 }
 0xa61   :  { %1820 = vrot.lane.b32.xlu0 %v1819_v31, %s2028_s16 }
 0xa62   :  { %v1068_v33 = vpop.f32.mrf.mxu0 }
 0xa63   :  { %v1835_v33 = vld [vmem:[%s2395_s9 + $0x10] sm:$0xff]  }
 0xa64   :  { %v1741_v34 = vpop.f32.mrf.mxu0 }
 0xa65   :  { %v1836_v34 = vld [vmem:[%s2395_s9 + $0x8] sm:$0xff]  }
 0xad3   :  { %v1821_v41 = vpop.permute.xlu0 %1820 }
 0xad4   :  { %v1823_v44 = vunpack.i.h.bf16 %v1821_v41  ;;  %v1822_v45 = vunpack.i.l.bf16 %v1821_v41 }
 0xad6   :  { %v1102_v49 = vsel %vm1100_vm5, %v1099_v47, %v1823_v44  ;;  %v1101_v50 = vsel %vm1100_vm5, %v1098_v46, %v1822_v45  ;;  %v1570_v46 = vld [vmem:[%s2396_s10] ss:$0 sm:$0xff] }
 0xad7   :  { %v1103_v51 = vpack.c.bf16 %v1102_v49, %v1101_v50 }
 0xad9   :  { %1747 = vmatmul.mubr.msk.bf16.vlgmr.msra.gmra.mxu1 %vm136_vm1, %v1103_v51 }
 0xada   :  { %1774 = vmatprep.mubr.msk.bf16.mxu1 %vm2014_vm0, %v2013_v0  ;;  %1759 = vmatpush3.bf16.msra.mxu1 %v1830_v48 }
 0xadb   :  { %1760 = vmatprep.subr.bf16.mxu1 %v2013_v0 }
 0xade   :  { %1761 = vmatpush3.bf16.msra.mxu1 %v1831_v52 }
 0xadf   :  { %1762 = vmatprep.subr.bf16.mxu1 %v2013_v0 }
 0xae2   :  { %1763 = vmatpush3.bf16.msra.mxu1 %v1832_v54 }
 0xae3   :  { %1764 = vmatprep.subr.bf16.mxu1 %v2013_v0 }
 0xae6   :  { %1765 = vmatpush3.bf16.msra.mxu1 %v1833_v15  ;;  %v1579_v15 = vld [vmem:[%s2397_s11] ss:$0 sm:$0xff]  ;;  %s2029_s11 = smov [#allocation11]  }
 0xae7   :  { %1766 = vmatprep.subr.bf16.mxu1 %v2013_v0 }
 0xaea   :  { %1767 = vmatpush3.bf16.msra.mxu1 %v1834_v16 }
 0xaeb   :  { %1768 = vmatprep.subr.bf16.mxu1 %v2013_v0 }
 0xaee   :  { %1769 = vmatpush3.bf16.msra.mxu1 %v1835_v33 }
 0xaef   :  { %1770 = vmatprep.subr.bf16.mxu1 %v2013_v0 }
 0xaf2   :  { %1771 = vmatpush3.bf16.msra.mxu1 %v1836_v34 }
 0xaf3   :  { %1772 = vmatprep.subr.bf16.mxu1 %v2013_v0 }
 0xaf6   :  { %1773 = vmatpush3.bf16.msra.mxu1 %v1837_v35 }
 0xb99   :  { %v1164_v55 = vpop.f32.mrf.mxu1 }
 0xb9a   :  { %v1165_v56 = vadd.f32 %v1560_v53, %v1164_v55 }
 0xb9b   :  { %v1748_v57 = vpop.f32.mrf.mxu1 }
 0xb9c   :  { %v1171_v63 = vadd.f32 %v1165_v56, %v2141_v3 }
 0xb9d   :  { %v1167_v58 = vpop.f32.mrf.mxu1 }
 0xb9e   :  { %v1168_v59 = vadd.f32 %v1560_v53, %v1167_v58  ;;  %v1173_v60 = vsel %vm136_vm1, %v1171_v63, 0.0 }
 0xb9f   :  { %1174 = vadd.xlane.f32.xlu1 %v1173_v60  ;;  %v1749_v61 = vpop.f32.mrf.mxu1 }
 0xba0   :  { %v1172_v62 = vadd.f32 %v1168_v59, %v2146_v4  ;;  %v1828_v4 = vld [vmem:[%s2393_s7 + $0x8] sm:$0xff]  }
 0xba1   :  { %1751 = vmatpush3.bf16.msra.mxu0 %v1828_v4 }
 0xba2   :  { %v1176_v1 = vsel %vm136_vm1, %v1172_v62, 0.0  ;;  %1752 = vmatprep.subr.bf16.mxu0 %v2013_v0 }
 0xba3   :  { %1177 = vadd.xlane.f32.xlu0 %v1176_v1 }
 0xba5   :  { %1753 = vmatpush3.bf16.msra.mxu0 %v1829_v13 }
 0xba6   :  { %1778 = vmatprep.subr.bf16.mxu0 %v2013_v0 }
 0xc28   :  { %v1175_v2 = vpop.xlane.xlu1 %1174 }
 0xc29   :  { %v1180_v5 = vmul.f32 0.03125, %v1175_v2 }
 0xc2b   :  { %v1182_v6 = vsub.f32 %v1171_v63, %v1180_v5 }
 0xc2c   :  { %v1178_v7 = vpop.xlane.xlu0 %1177 }
 0xc2d   :  { %v1181_v8 = vmul.f32 0.03125, %v1178_v7  ;;  %v1184_v9 = vmul.f32 %v1182_v6, %v1182_v6 }
 0xc2f   :  { %v1183_v11 = vsub.f32 %v1172_v62, %v1181_v8  ;;  %v1186_v3 = vsel %vm136_vm1, %v1184_v9, 0.0  ;;  %v1838_v9 = vld [vmem:[%s2399_s13 + $0x8] sm:$0xff]  }
 0xc30   :  { %1187 = vadd.xlane.f32.xlu0 %v1186_v3 }
 0xc31   :  { %v1185_v12 = vmul.f32 %v1183_v11, %v1183_v11 }
 0xc33   :  { %v1189_v10 = vsel %vm136_vm1, %v1185_v12, 0.0 }
 0xc34   :  { %1190 = vadd.xlane.f32.xlu1 %v1189_v10 }
 0xcb9   :  { %v1188_v17 = vpop.xlane.xlu0 %1187 }
 0xcba   :  { %v1192_v18 = vmul.f32 0.03125, %v1188_v17 }
 0xcbc   :  { %v1194_v19 = vadd.f32 1e-05, %v1192_v18 }
 0xcbd   :  { %v1191_v20 = vpop.xlane.xlu1 %1190 }
 0xcbe   :  { %1872 = vrsqrt.f32 %v1194_v19  ;;  %v1193_v21 = vmul.f32 0.03125, %v1191_v20 }
 0xcc0   :  { %v1195_v22 = vadd.f32 1e-05, %v1193_v21 }
 0xcc2   :  { %1874 = vrsqrt.f32 %v1195_v22 }
 0xccb   :  { %v1873_v14 = vpop.eup %1872 }
 0xccc   :  { %v1198_v23 = vmul.f32 %v1873_v14, %v1182_v6  ;;  %v1581_v14 = vld [vmem:[%s2400_s14] ss:$0 sm:$0xff] }
 0xcce   :  { %v1207_v27 = vmul.f32 %v1564_v24, %v1198_v23 }
 0xccf   :  { %v1875_v25 = vpop.eup %1874 }
 0xcd0   :  { %v1199_v26 = vmul.f32 %v1875_v25, %v1183_v11  ;;  %v1216_v30 = vadd.f32 %v1565_v28, %v1207_v27  ;;  %v1839_v11 = vld [vmem:[%s2399_s13] sm:$0xff]  }
 0xcd2   :  { %v1208_v29 = vmul.f32 %v1564_v24, %v1199_v26 }
 0xcd4   :  { %v1217_v31 = vadd.f32 %v1565_v28, %v1208_v29 }
 0xcd6   :  { %v1218_v32 = vpack.c.bf16 %v1217_v31, %v1216_v30 }
 0xcd8   :  { %1755 = vmatmul.mubr.msk.bf16.vlgmr.msra.gmra.mxu0 %vm136_vm1, %v1218_v32 }
 0xcd9   :  { %1782 = vmatprep.mubr.msk.bf16.mxu0 %vm2014_vm0, %v2013_v0  ;;  %1779 = vmatpush3.bf16.msra.mxu0 %v1838_v9 }
 0xcda   :  { %1780 = vmatprep.subr.bf16.mxu0 %v2013_v0  ;;  %v1580_v0 = vld [vmem:[%s2398_s12] ss:$0 sm:$0xff]  ;;  %s1526_s12 = sshll.u32 %s2029_s11, 4  ;;  %s1527_s12 = int_to_ptr.vmem [resolvable:$true] %s1526_s12 }
 0xcdb   :  { %s1980_s1 = scalar_lea.vmem %s1527_s12, 256  ;;  %p1985_p12 = scmp.lt.s32.totalorder %s1527_s12, %s1527_s12 }
 0xcdc   :  { %p1981_p11 = scmp.ne.s32.totalorder %s1527_s12, %s1980_s1  ;;  %p1986_p13 = scmp.lt.s32.totalorder %s1980_s1, %s1980_s1 }
 0xcdd   :  { %1781 = vmatpush3.bf16.msra.mxu0 %v1839_v11 }
 0xcde   :  { %p1987_p0 = por %p1986_p13, %p1985_p12 }
 0xce0   :  { %p1988_p1 = pnand %p1987_p0, %p1981_p11 }
 0xd98   :  { %v1279_v37 = vpop.f32.mrf.mxu0 }
 0xd99   :  { %v1280_v39 = vadd.f32 %v1566_v36, %v1279_v37 }
 0xd9a   :  { %v1756_v38 = vpop.f32.mrf.mxu0 }
 0xd9b   :  { %v1286_v43 = vmax.f32 %v1280_v39, 0.0 }
 0xd9c   :  { %v1282_v40 = vpop.f32.mrf.mxu0 }
 0xd9d   :  { %v1283_v41 = vadd.f32 %v1566_v36, %v1282_v40 }
 0xd9e   :  { %v1757_v42 = vpop.f32.mrf.mxu0 }
 0xd9f   :  { %v1287_v44 = vmax.f32 %v1283_v41, 0.0 }
 0xda1   :  { %v1288_v45 = vpack.c.bf16 %v1287_v44, %v1286_v43 }
 0xda3   :  { %1775 = vmatmul.mubr.bf16.vlgmr.msra.gmra.mxu1 %v1288_v45 }
 0xe63   :  { %v1394_v47 = vpop.f32.mrf.mxu1 }
 0xe64   :  { %v1395_v49 = vadd.f32 %v1570_v46, %v1394_v47 }
 0xe65   :  { %v1776_v50 = vpop.f32.mrf.mxu1 }
 0xe66   :  { %v1401_v51 = vadd.f32 %v1395_v49, %v1216_v30 }
 0xe67   :  { %v1397_v53 = vpop.f32.mrf.mxu1 }
 0xe68   :  { %v1398_v55 = vadd.f32 %v1570_v46, %v1397_v53  ;;  %v1403_v56 = vsel %vm136_vm1, %v1401_v51, 0.0 }
 0xe69   :  { %1404 = vadd.xlane.f32.xlu0 %v1403_v56  ;;  %v1777_v57 = vpop.f32.mrf.mxu1 }
 0xe6a   :  { %v1402_v63 = vadd.f32 %v1398_v55, %v1217_v31 }
 0xe6c   :  { %v1406_v58 = vsel %vm136_vm1, %v1402_v63, 0.0 }
 0xe6d   :  { %1407 = vadd.xlane.f32.xlu1 %v1406_v58 }
 0xef2   :  { %v1405_v59 = vpop.xlane.xlu0 %1404 }
 0xef3   :  { %v1409_v60 = vmul.f32 0.03125, %v1405_v59 }
 0xef5   :  { %v1411_v61 = vsub.f32 %v1401_v51, %v1409_v60 }
 0xef6   :  { %v1408_v62 = vpop.xlane.xlu1 %1407 }
 0xef7   :  { %v1410_v1 = vmul.f32 0.03125, %v1408_v62  ;;  %v1413_v2 = vmul.f32 %v1411_v61, %v1411_v61 }
 0xef9   :  { %v1412_v5 = vsub.f32 %v1402_v63, %v1410_v1  ;;  %v1415_v6 = vsel %vm136_vm1, %v1413_v2, 0.0 }
 0xefa   :  { %1416 = vadd.xlane.f32.xlu0 %v1415_v6 }
 0xefb   :  { %v1414_v7 = vmul.f32 %v1412_v5, %v1412_v5 }
 0xefd   :  { %v1418_v8 = vsel %vm136_vm1, %v1414_v7, 0.0 }
 0xefe   :  { %1419 = vadd.xlane.f32.xlu1 %v1418_v8 }
 0xf83   :  { %v1417_v3 = vpop.xlane.xlu0 %1416 }
 0xf84   :  { %v1421_v12 = vmul.f32 0.03125, %v1417_v3 }
 0xf86   :  { %v1423_v10 = vadd.f32 1e-05, %v1421_v12 }
 0xf87   :  { %v1420_v4 = vpop.xlane.xlu1 %1419 }
 0xf88   :  { %1876 = vrsqrt.f32 %v1423_v10  ;;  %v1422_v13 = vmul.f32 0.03125, %v1420_v4 }
 0xf8a   :  { %v1424_v48 = vadd.f32 1e-05, %v1422_v13 }
 0xf8c   :  { %1878 = vrsqrt.f32 %v1424_v48 }
 0xf95   :  { %v1877_v52 = vpop.eup %1876 }
 0xf96   :  { %v1427_v54 = vmul.f32 %v1877_v52, %v1411_v61 }
 0xf98   :  { %v1436_v18 = vmul.f32 %v1579_v15, %v1427_v54 }
 0xf99   :  { %v1879_v16 = vpop.eup %1878 }
 0xf9a   :  { %v1428_v17 = vmul.f32 %v1879_v16, %v1412_v5  ;;  %v1445_v20 = vadd.f32 %v1580_v0, %v1436_v18 }
 0xf9c   :  { %v1437_v19 = vmul.f32 %v1579_v15, %v1428_v17 }
 0xf9e   :  { %v1446_v21 = vadd.f32 %v1580_v0, %v1437_v19 }
 0xfa0   :  { %v1447_v22 = vpack.c.bf16 %v1446_v21, %v1445_v20 }
 0xfa2   :  { %1783 = vmatmul.mubr.msk.bf16.vlgmr.msra.gmra.mxu0 %vm136_vm1, %v1447_v22 }
0x1062   :  { %v1508_v23 = vpop.f32.mrf.mxu0 }
0x1063   :  { %v1509_v24 = vadd.f32 %v1581_v14, %v1508_v23 }
0x1064   :  { %v1784_v25 = vpop.f32.mrf.mxu0 }
0x1065   :  { %v1515_v26 = vadd.f32 %v1509_v24, %v1445_v20 }
0x1066   :  { %v1511_v27 = vpop.f32.mrf.mxu0 }
0x1067   :  { %v1517_v28 = vmax.f32 %v1515_v26, 0.0  ;;  %v1512_v29 = vadd.f32 %v1581_v14, %v1511_v27 }
0x1068   :  { %v1785_v30 = vpop.f32.mrf.mxu0 }
0x1069   :  { %1519 = vst.msk [vmem:[#allocation11] sm:$0xff] %vm136_vm1, %v1517_v28  ;;  %v1516_v31 = vadd.f32 %v1512_v29, %v1446_v21 }
0x106b   :  { %v1518_v32 = vmax.f32 %v1516_v31, 0.0 }
0x106d   :  { %1520 = vst.msk [vmem:[#allocation11 + $0x8] sm:$0xff] %vm136_vm1, %v1518_v32 }
0x106e   :  { %1991 = shalt.err (!%p1988_p1)
}
0x106f   :  { %s2030_s14 = smov 128  }
0x1070   :  { %1532 = dma.vmem_to_hbm [thread:$0]  %s1527_s12, 256, %s2401_s15, [#allocation4], %s2030_s14, %s2030_s14, %s2026_s28  }
0x1071   :  { %2006 = dma.done.wait [#allocation4], 256  }
0x1072   :  { %2007 = vsyncadd [#allocation4], 4294967040 }
0x1073   :  { %1536 = vsyncpa [#allocation3], 1 }
0x1074   :  { %1537 = vsyncpa [#allocation6], 1 }
0x1075   :  { %1538 = vsyncpa [#allocation9], 1 }
0x1076   :  { %1539 = vsyncpa [#allocation4], 1 }

</bundles_post_ra>
